<compile_context>
chip_gen: v7x
topology: tpu7x:2x2x1
jax: 0.10.0
libtpu: 0.0.40
codegen_flags: <defaults>
</compile_context>

<pallas_src>
import math

import jax
import jax.numpy as jnp
from jax.experimental import pallas as pl

# ---------------------------------------------------------------- config ----
B = 2          # batch
S = 8          # seq_len
H = 32         # hidden_dim
P = 64         # projection_dim
NH = 2         # n_heads
HD = 16        # head_dim
NL = 2         # n_layers
VOCAB = 50
LN_EPS = 1e-5
INV_SQRT_HD = 1.0 / math.sqrt(HD)
NEG_INF = -1e30


# ---------------------------------------------------------------- kernel ----
def encoder_stack_kernel(x_ref, bias_ref, wqkv_ref, bqkv_ref, wo_ref,
                         w1_ref, b1_ref, w2_ref, hvec_ref,
                         out_ref, mems_ref, att_ref):
    """Entire NL-layer encoder stack for the whole batch, VMEM-resident."""
    x = x_ref[...]                    # [B*S, H]  f32  (current layer input)
    bias = bias_ref[...]              # [B, S, S] f32  additive mask (0 / -1e30)

    for l in range(NL):               # static unroll over layers
        mems_ref[l] = x               # new_mem = layer input (mem is None)

        hv = hvec_ref[l]              # [6, H]: bo, ln1_g, ln1_b, b2, ln2_g, ln2_b
        bo, g1, be1 = hv[0:1, :], hv[1:2, :], hv[2:3, :]
        b2, g2, be2 = hv[3:4, :], hv[4:5, :], hv[5:6, :]

        # ----- self-attention: fused Q|K|V projection (one MXU matmul) -----
        qkv = jnp.dot(x.astype(jnp.bfloat16), wqkv_ref[l],
                      preferred_element_type=jnp.float32) + bqkv_ref[l]  # [B*S, 3*NH*HD]

        ctxs = []
        for h in range(NH):           # static unroll; only scores/context per head
            q = qkv[:, h * HD:(h + 1) * HD].reshape(B, S, HD)
            k = qkv[:, (NH + h) * HD:(NH + h + 1) * HD].reshape(B, S, HD)
            v = qkv[:, (2 * NH + h) * HD:(2 * NH + h + 1) * HD].reshape(B, S, HD)

            s = jnp.einsum('bqd,bkd->bqk', q.astype(jnp.bfloat16),
                           k.astype(jnp.bfloat16),
                           preferred_element_type=jnp.float32) * INV_SQRT_HD
            s = s + bias                                   # additive mask bias
            s = s - jnp.max(s, axis=-1, keepdims=True)
            e = jnp.exp(s)
            p = e * pl.reciprocal(jnp.sum(e, axis=-1, keepdims=True), approx=True)
            att_ref[l * NH + h] = p                        # [B, S, S]

            ctx = jnp.einsum('bqk,bkd->bqd', p.astype(jnp.bfloat16),
                             v.astype(jnp.bfloat16),
                             preferred_element_type=jnp.float32)         # [B, S, HD]
            ctxs.append(ctx.reshape(B * S, HD))

        ctx_all = jnp.concatenate(ctxs, axis=-1)           # [B*S, NH*HD]
        o = jnp.dot(ctx_all.astype(jnp.bfloat16), wo_ref[l],
                    preferred_element_type=jnp.float32) + bo

        # residual + LayerNorm 1 (post-norm), f32 epilogue
        y = x + o
        mu = jnp.mean(y, axis=-1, keepdims=True)
        var = jnp.mean((y - mu) ** 2, axis=-1, keepdims=True)
        y = (y - mu) * jax.lax.rsqrt(var + LN_EPS) * g1 + be1

        # ----- position-wise feed-forward -----
        f = jnp.dot(y.astype(jnp.bfloat16), w1_ref[l],
                    preferred_element_type=jnp.float32) + b1_ref[l]
        f = jnp.maximum(f, 0.0)                            # ReLU
        f2 = jnp.dot(f.astype(jnp.bfloat16), w2_ref[l],
                     preferred_element_type=jnp.float32) + b2

        z = y + f2
        mu = jnp.mean(z, axis=-1, keepdims=True)
        var = jnp.mean((z - mu) ** 2, axis=-1, keepdims=True)
        x = (z - mu) * jax.lax.rsqrt(var + LN_EPS) * g2 + be2

    out_ref[...] = x


# -------------------------------------------------------------- wrappers ----
def _stack_layer_params(layers):
    """Stack per-layer params along a leading NL axis; matmul weights -> bf16."""
    wqkv = jnp.stack([jnp.concatenate([lp["wq"], lp["wk"], lp["wv"]], axis=1)
                      for lp in layers]).astype(jnp.bfloat16)    # [NL, H, 3*NH*HD]
    bqkv = jnp.stack([jnp.concatenate([lp["bq"], lp["bk"], lp["bv"]], axis=1)
                      for lp in layers])                         # [NL, 1, 3*NH*HD]
    wo = jnp.stack([lp["wo"] for lp in layers]).astype(jnp.bfloat16)   # [NL, NH*HD, H]
    w1 = jnp.stack([lp["w1"] for lp in layers]).astype(jnp.bfloat16)   # [NL, H, P]
    b1 = jnp.stack([lp["b1"] for lp in layers])                        # [NL, 1, P]
    w2 = jnp.stack([lp["w2"] for lp in layers]).astype(jnp.bfloat16)   # [NL, P, H]
    hvec = jnp.stack([jnp.concatenate([lp["bo"], lp["ln1_g"], lp["ln1_b"],
                                       lp["b2"], lp["ln2_g"], lp["ln2_b"]], axis=0)
                      for lp in layers])                         # [NL, 6, H]
    return wqkv, bqkv, wo, w1, b1, w2, hvec


def encoder_network_forward(tokens, mask_bool, params):
    """Mirrors EncoderNetwork.forward(x, mem=None, mask)."""
    # TODO(synk): embedding gather kept in plain JAX (glue, not the hot path).
    emb = jnp.take(params["emb"], tokens, axis=0) * math.sqrt(H)
    emb = emb + params["pos"][None, :S, :]
    x2d = emb.reshape(B * S, H).astype(jnp.float32)

    # additive mask bias computed ONCE (True / 1 = masked key position)
    mask_bias = jnp.where(mask_bool, jnp.float32(NEG_INF), jnp.float32(0.0))

    wqkv, bqkv, wo, w1, b1, w2, hvec = _stack_layer_params(params["layers"])

    out2d, mems2d, att = pl.pallas_call(
        encoder_stack_kernel,
        out_shape=(
            jax.ShapeDtypeStruct((B * S, H), jnp.float32),        # final hidden
            jax.ShapeDtypeStruct((NL, B * S, H), jnp.float32),    # new_mems
            jax.ShapeDtypeStruct((NL * NH, B, S, S), jnp.float32) # att probs
        ),
    )(x2d, mask_bias, wqkv, bqkv, wo, w1, b1, w2, hvec)

    out = out2d.reshape(B, S, H)
    new_mems = [mems2d[l].reshape(B, S, H) for l in range(NL)]
    att5 = att.reshape(NL, NH, B, S, S)
    att_probs = [jnp.transpose(att5[l], (1, 0, 2, 3)) for l in range(NL)]
    return out, new_mems, att_probs


encoder_network_forward_jit = jax.jit(encoder_network_forward)


# ----------------------------------------------------------------- setup ----
def init_params(key):
    def dense(k, shape, scale=0.02):
        return scale * jax.random.normal(k, shape, dtype=jnp.float32)

    keys = jax.random.split(key, 2 + NL)
    params = {
        "emb": dense(keys[0], (VOCAB, H)),
        "pos": dense(keys[1], (S, H)),
        "layers": [],
    }
    for i in range(NL):
        lk = jax.random.split(keys[2 + i], 8)
        params["layers"].append({
            "wq": dense(lk[0], (H, NH * HD)),
            "bq": jnp.zeros((1, NH * HD), jnp.float32),
            "wk": dense(lk[1], (H, NH * HD)),
            "bk": jnp.zeros((1, NH * HD), jnp.float32),
            "wv": dense(lk[2], (H, NH * HD)),
            "bv": jnp.zeros((1, NH * HD), jnp.float32),
            "wo": dense(lk[3], (NH * HD, H)),
            "bo": jnp.zeros((1, H), jnp.float32),
            "ln1_g": jnp.ones((1, H), jnp.float32),
            "ln1_b": jnp.zeros((1, H), jnp.float32),
            "w1": dense(lk[4], (H, P)),
            "b1": jnp.zeros((1, P), jnp.float32),
            "w2": dense(lk[5], (P, H)),
            "b2": jnp.zeros((1, H), jnp.float32),
            "ln2_g": jnp.ones((1, H), jnp.float32),
            "ln2_b": jnp.zeros((1, H), jnp.float32),
        })
    return params


if __name__ == "__main__":
    key = jax.random.PRNGKey(0)
    pk, tk = jax.random.split(key)
    params = init_params(pk)

    # integer token ids, shape [B, S]  (matches x: [batch_size, seq_len])
    tokens = jax.random.randint(tk, (B, S), 0, VOCAB, dtype=jnp.int32)

    # padding mask (bidirectional encoder, no memory): True = masked key pos
    lens = jnp.array([S, S - 2], dtype=jnp.int32)
    pad = jnp.arange(S)[None, :] >= lens[:, None]           # [B, S]
    mask = jnp.broadcast_to(pad[:, None, :], (B, S, S))     # [B, S, S]

    out, new_mems, att_probs = encoder_network_forward_jit(tokens, mask, params)
    jax.block_until_ready(out)
    for m in new_mems:
        jax.block_until_ready(m)
    for a in att_probs:
        jax.block_until_ready(a)

    assert out.shape == (B, S, H)
    assert len(new_mems) == NL and len(att_probs) == NL
    assert new_mems[0].shape == (B, S, H)
    assert att_probs[0].shape == (B, NH, S, S)
    assert bool(jnp.all(jnp.isfinite(out)))
    assert bool(jnp.all(jnp.isfinite(att_probs[0])))
    print("KERNEL_OK")
</pallas_src>

<mosaic_0001>
module attributes {stable_mosaic.version = 11 : i64} {
  func.func @encoder_stack_kernel(%arg0: memref<16x32xf32, #tpu.memory_space<vmem>>, %arg1: memref<2x8x8xf32, #tpu.memory_space<vmem>>, %arg2: memref<2x32x96xbf16, #tpu.memory_space<vmem>>, %arg3: memref<2x1x96xf32, #tpu.memory_space<vmem>>, %arg4: memref<2x32x32xbf16, #tpu.memory_space<vmem>>, %arg5: memref<2x32x64xbf16, #tpu.memory_space<vmem>>, %arg6: memref<2x1x64xf32, #tpu.memory_space<vmem>>, %arg7: memref<2x64x32xbf16, #tpu.memory_space<vmem>>, %arg8: memref<2x6x32xf32, #tpu.memory_space<vmem>>, %arg9: memref<16x32xf32, #tpu.memory_space<vmem>>, %arg10: memref<2x16x32xf32, #tpu.memory_space<vmem>>, %arg11: memref<4x2x8x8xf32, #tpu.memory_space<vmem>>) attributes {dimension_semantics = [], scalar_prefetch = 0 : i64, scratch_operands = 0 : i64, tpu.core_type = #tpu.core_type<tc>} {
    %c0 = arith.constant 0 : index
    %c0_0 = arith.constant 0 : index
    %0 = vector.load %arg0[%c0, %c0_0] : memref<16x32xf32, #tpu.memory_space<vmem>>, vector<16x32xf32>
    %c0_1 = arith.constant 0 : index
    %c0_2 = arith.constant 0 : index
    %c0_3 = arith.constant 0 : index
    %1 = vector.load %arg1[%c0_1, %c0_2, %c0_3] : memref<2x8x8xf32, #tpu.memory_space<vmem>>, vector<2x8x8xf32>
    %c0_4 = arith.constant 0 : index
    %c0_5 = arith.constant 0 : index
    %c0_6 = arith.constant 0 : index
    %2 = vector.load %arg10[%c0_4, %c0_5, %c0_6] : memref<2x16x32xf32, #tpu.memory_space<vmem>>, vector<1x16x32xf32>
    %3 = vector.shape_cast %2 : vector<1x16x32xf32> to vector<16x32xf32>
    %4 = vector.shape_cast %0 : vector<16x32xf32> to vector<1x16x32xf32>
    tpu.vector_store %arg10[%c0_4, %c0_5, %c0_6], %4 {strides = array<i32>} : memref<2x16x32xf32, #tpu.memory_space<vmem>>, vector<1x16x32xf32>,
    %c0_7 = arith.constant 0 : index
    %c0_8 = arith.constant 0 : index
    %c0_9 = arith.constant 0 : index
    %5 = vector.load %arg8[%c0_7, %c0_8, %c0_9] : memref<2x6x32xf32, #tpu.memory_space<vmem>>, vector<1x6x32xf32>
    %6 = vector.shape_cast %5 : vector<1x6x32xf32> to vector<6x32xf32>
    %7 = vector.extract_strided_slice %6 {offsets = [0, 0], sizes = [1, 32], strides = [1, 1]} : vector<6x32xf32> to vector<1x32xf32>
    %8 = vector.extract_strided_slice %6 {offsets = [1, 0], sizes = [1, 32], strides = [1, 1]} : vector<6x32xf32> to vector<1x32xf32>
    %9 = vector.extract_strided_slice %6 {offsets = [2, 0], sizes = [1, 32], strides = [1, 1]} : vector<6x32xf32> to vector<1x32xf32>
    %10 = vector.extract_strided_slice %6 {offsets = [3, 0], sizes = [1, 32], strides = [1, 1]} : vector<6x32xf32> to vector<1x32xf32>
    %11 = vector.extract_strided_slice %6 {offsets = [4, 0], sizes = [1, 32], strides = [1, 1]} : vector<6x32xf32> to vector<1x32xf32>
    %12 = vector.extract_strided_slice %6 {offsets = [5, 0], sizes = [1, 32], strides = [1, 1]} : vector<6x32xf32> to vector<1x32xf32>
    %13 = arith.truncf %0 : vector<16x32xf32> to vector<16x32xbf16>
    %c0_10 = arith.constant 0 : index
    %c0_11 = arith.constant 0 : index
    %c0_12 = arith.constant 0 : index
    %14 = vector.load %arg2[%c0_10, %c0_11, %c0_12] : memref<2x32x96xbf16, #tpu.memory_space<vmem>>, vector<1x32x96xbf16>
    %15 = vector.shape_cast %14 : vector<1x32x96xbf16> to vector<32x96xbf16>
    %cst = arith.constant dense<0.000000e+00> : vector<16x96xf32>
    %16 = tpu.matmul %13, %15, %cst {dimension_numbers = #tpu.dot_dimension_numbers<[1], [0], [0], [1], [0, 0, 1, 1], [], []>} : vector<16x32xbf16>, vector<32x96xbf16>, vector<16x96xf32> -> vector<16x96xf32>
    %c0_13 = arith.constant 0 : index
    %c0_14 = arith.constant 0 : index
    %c0_15 = arith.constant 0 : index
    %17 = vector.load %arg3[%c0_13, %c0_14, %c0_15] : memref<2x1x96xf32, #tpu.memory_space<vmem>>, vector<1x1x96xf32>
    %18 = vector.shape_cast %17 : vector<1x1x96xf32> to vector<1x96xf32>
    %19 = vector.broadcast %18 : vector<1x96xf32> to vector<16x96xf32>
    %20 = arith.addf %16, %19 : vector<16x96xf32>
    %21 = vector.extract_strided_slice %20 {offsets = [0, 0], sizes = [16, 16], strides = [1, 1]} : vector<16x96xf32> to vector<16x16xf32>
    %22 = vector.shape_cast %21 : vector<16x16xf32> to vector<2x8x16xf32>
    %23 = vector.extract_strided_slice %20 {offsets = [0, 32], sizes = [16, 16], strides = [1, 1]} : vector<16x96xf32> to vector<16x16xf32>
    %24 = vector.shape_cast %23 : vector<16x16xf32> to vector<2x8x16xf32>
    %25 = vector.extract_strided_slice %20 {offsets = [0, 64], sizes = [16, 16], strides = [1, 1]} : vector<16x96xf32> to vector<16x16xf32>
    %26 = vector.shape_cast %25 : vector<16x16xf32> to vector<2x8x16xf32>
    %27 = arith.truncf %22 : vector<2x8x16xf32> to vector<2x8x16xbf16>
    %28 = arith.truncf %24 : vector<2x8x16xf32> to vector<2x8x16xbf16>
    "tpu.trace_start"() <{level = 10 : i32, message = "bqd,bkd->bqk"}> : () -> ()
    %cst_16 = arith.constant dense<0.000000e+00> : vector<2x8x8xf32>
    %29 = tpu.matmul %27, %28, %cst_16 {dimension_numbers = #tpu.dot_dimension_numbers<[2], [2], [1], [1], [0, 0, 0, 1, 1, 1], [0], [0]>} : vector<2x8x16xbf16>, vector<2x8x16xbf16>, vector<2x8x8xf32> -> vector<2x8x8xf32>
    "tpu.trace_stop"() : () -> ()
    %cst_17 = arith.constant 2.500000e-01 : f32
    %30 = vector.broadcast %cst_17 : f32 to vector<2x8x8xf32>
    %31 = arith.mulf %29, %30 : vector<2x8x8xf32>
    %32 = arith.addf %31, %1 : vector<2x8x8xf32>
    %cst_18 = arith.constant dense<0xFF800000> : vector<2x8xf32>
    %33 = vector.multi_reduction <maximumf>, %32, %cst_18 [2] : vector<2x8x8xf32> to vector<2x8xf32>
    %34 = vector.shape_cast %33 : vector<2x8xf32> to vector<2x8x1xf32>
    %35 = vector.broadcast %34 : vector<2x8x1xf32> to vector<2x8x8xf32>
    %36 = arith.subf %32, %35 : vector<2x8x8xf32>
    %37 = math.exp %36 : vector<2x8x8xf32>
    %cst_19 = arith.constant dense<0.000000e+00> : vector<2x8xf32>
    %38 = vector.multi_reduction <add>, %37, %cst_19 [2] : vector<2x8x8xf32> to vector<2x8xf32>
    %39 = vector.shape_cast %38 : vector<2x8xf32> to vector<2x8x1xf32>
    %40 = tpu.reciprocal %39 {approx = true} : vector<2x8x1xf32> -> vector<2x8x1xf32>
    %41 = vector.broadcast %40 : vector<2x8x1xf32> to vector<2x8x8xf32>
    %42 = arith.mulf %37, %41 : vector<2x8x8xf32>
    %c0_20 = arith.constant 0 : index
    %c0_21 = arith.constant 0 : index
    %c0_22 = arith.constant 0 : index
    %c0_23 = arith.constant 0 : index
    %43 = vector.load %arg11[%c0_20, %c0_21, %c0_22, %c0_23] : memref<4x2x8x8xf32, #tpu.memory_space<vmem>>, vector<1x2x8x8xf32>
    %44 = vector.shape_cast %43 : vector<1x2x8x8xf32> to vector<2x8x8xf32>
    %45 = vector.shape_cast %42 : vector<2x8x8xf32> to vector<1x2x8x8xf32>
    tpu.vector_store %arg11[%c0_20, %c0_21, %c0_22, %c0_23], %45 {strides = array<i32>} : memref<4x2x8x8xf32, #tpu.memory_space<vmem>>, vector<1x2x8x8xf32>,
    %46 = arith.truncf %42 : vector<2x8x8xf32> to vector<2x8x8xbf16>
    %47 = arith.truncf %26 : vector<2x8x16xf32> to vector<2x8x16xbf16>
    "tpu.trace_start"() <{level = 10 : i32, message = "bqk,bkd->bqd"}> : () -> ()
    %cst_24 = arith.constant dense<0.000000e+00> : vector<2x8x16xf32>
    %48 = tpu.matmul %46, %47, %cst_24 {dimension_numbers = #tpu.dot_dimension_numbers<[2], [1], [1], [2], [0, 0, 0, 1, 1, 2], [0], [0]>} : vector<2x8x8xbf16>, vector<2x8x16xbf16>, vector<2x8x16xf32> -> vector<2x8x16xf32>
    "tpu.trace_stop"() : () -> ()
    %49 = vector.shape_cast %48 : vector<2x8x16xf32> to vector<16x16xf32>
    %50 = vector.extract_strided_slice %20 {offsets = [0, 16], sizes = [16, 16], strides = [1, 1]} : vector<16x96xf32> to vector<16x16xf32>
    %51 = vector.shape_cast %50 : vector<16x16xf32> to vector<2x8x16xf32>
    %52 = vector.extract_strided_slice %20 {offsets = [0, 48], sizes = [16, 16], strides = [1, 1]} : vector<16x96xf32> to vector<16x16xf32>
    %53 = vector.shape_cast %52 : vector<16x16xf32> to vector<2x8x16xf32>
    %54 = vector.extract_strided_slice %20 {offsets = [0, 80], sizes = [16, 16], strides = [1, 1]} : vector<16x96xf32> to vector<16x16xf32>
    %55 = vector.shape_cast %54 : vector<16x16xf32> to vector<2x8x16xf32>
    %56 = arith.truncf %51 : vector<2x8x16xf32> to vector<2x8x16xbf16>
    %57 = arith.truncf %53 : vector<2x8x16xf32> to vector<2x8x16xbf16>
    "tpu.trace_start"() <{level = 10 : i32, message = "bqd,bkd->bqk"}> : () -> ()
    %cst_25 = arith.constant dense<0.000000e+00> : vector<2x8x8xf32>
    %58 = tpu.matmul %56, %57, %cst_25 {dimension_numbers = #tpu.dot_dimension_numbers<[2], [2], [1], [1], [0, 0, 0, 1, 1, 1], [0], [0]>} : vector<2x8x16xbf16>, vector<2x8x16xbf16>, vector<2x8x8xf32> -> vector<2x8x8xf32>
    "tpu.trace_stop"() : () -> ()
    %cst_26 = arith.constant 2.500000e-01 : f32
    %59 = vector.broadcast %cst_26 : f32 to vector<2x8x8xf32>
    %60 = arith.mulf %58, %59 : vector<2x8x8xf32>
    %61 = arith.addf %60, %1 : vector<2x8x8xf32>
    %cst_27 = arith.constant dense<0xFF800000> : vector<2x8xf32>
    %62 = vector.multi_reduction <maximumf>, %61, %cst_27 [2] : vector<2x8x8xf32> to vector<2x8xf32>
    %63 = vector.shape_cast %62 : vector<2x8xf32> to vector<2x8x1xf32>
    %64 = vector.broadcast %63 : vector<2x8x1xf32> to vector<2x8x8xf32>
    %65 = arith.subf %61, %64 : vector<2x8x8xf32>
    %66 = math.exp %65 : vector<2x8x8xf32>
    %cst_28 = arith.constant dense<0.000000e+00> : vector<2x8xf32>
    %67 = vector.multi_reduction <add>, %66, %cst_28 [2] : vector<2x8x8xf32> to vector<2x8xf32>
    %68 = vector.shape_cast %67 : vector<2x8xf32> to vector<2x8x1xf32>
    %69 = tpu.reciprocal %68 {approx = true} : vector<2x8x1xf32> -> vector<2x8x1xf32>
    %70 = vector.broadcast %69 : vector<2x8x1xf32> to vector<2x8x8xf32>
    %71 = arith.mulf %66, %70 : vector<2x8x8xf32>
    %c1 = arith.constant 1 : index
    %c0_29 = arith.constant 0 : index
    %c0_30 = arith.constant 0 : index
    %c0_31 = arith.constant 0 : index
    %72 = vector.load %arg11[%c1, %c0_29, %c0_30, %c0_31] : memref<4x2x8x8xf32, #tpu.memory_space<vmem>>, vector<1x2x8x8xf32>
    %73 = vector.shape_cast %72 : vector<1x2x8x8xf32> to vector<2x8x8xf32>
    %74 = vector.shape_cast %71 : vector<2x8x8xf32> to vector<1x2x8x8xf32>
    tpu.vector_store %arg11[%c1, %c0_29, %c0_30, %c0_31], %74 {strides = array<i32>} : memref<4x2x8x8xf32, #tpu.memory_space<vmem>>, vector<1x2x8x8xf32>,
    %75 = arith.truncf %71 : vector<2x8x8xf32> to vector<2x8x8xbf16>
    %76 = arith.truncf %55 : vector<2x8x16xf32> to vector<2x8x16xbf16>
    "tpu.trace_start"() <{level = 10 : i32, message = "bqk,bkd->bqd"}> : () -> ()
    %cst_32 = arith.constant dense<0.000000e+00> : vector<2x8x16xf32>
    %77 = tpu.matmul %75, %76, %cst_32 {dimension_numbers = #tpu.dot_dimension_numbers<[2], [1], [1], [2], [0, 0, 0, 1, 1, 2], [0], [0]>} : vector<2x8x8xbf16>, vector<2x8x16xbf16>, vector<2x8x16xf32> -> vector<2x8x16xf32>
    "tpu.trace_stop"() : () -> ()
    %78 = vector.shape_cast %77 : vector<2x8x16xf32> to vector<16x16xf32>
    %79 = tpu.concatenate %49, %78 in 1 : vector<16x16xf32>, vector<16x16xf32> -> vector<16x32xf32>
    %80 = arith.truncf %79 : vector<16x32xf32> to vector<16x32xbf16>
    %c0_33 = arith.constant 0 : index
    %c0_34 = arith.constant 0 : index
    %c0_35 = arith.constant 0 : index
    %81 = vector.load %arg4[%c0_33, %c0_34, %c0_35] : memref<2x32x32xbf16, #tpu.memory_space<vmem>>, vector<1x32x32xbf16>
    %82 = vector.shape_cast %81 : vector<1x32x32xbf16> to vector<32x32xbf16>
    %cst_36 = arith.constant dense<0.000000e+00> : vector<16x32xf32>
    %83 = tpu.matmul %80, %82, %cst_36 {dimension_numbers = #tpu.dot_dimension_numbers<[1], [0], [0], [1], [0, 0, 1, 1], [], []>} : vector<16x32xbf16>, vector<32x32xbf16>, vector<16x32xf32> -> vector<16x32xf32>
    %84 = vector.broadcast %7 : vector<1x32xf32> to vector<16x32xf32>
    %85 = arith.addf %83, %84 : vector<16x32xf32>
    %86 = arith.addf %0, %85 : vector<16x32xf32>
    %cst_37 = arith.constant dense<0.000000e+00> : vector<16xf32>
    %87 = vector.multi_reduction <add>, %86, %cst_37 [1] : vector<16x32xf32> to vector<16xf32>
    %88 = vector.shape_cast %87 : vector<16xf32> to vector<16x1xf32>
    %cst_38 = arith.constant 3.200000e+01 : f32
    %89 = vector.broadcast %cst_38 : f32 to vector<16x1xf32>
    %90 = arith.divf %88, %89 : vector<16x1xf32>
    %91 = vector.broadcast %90 : vector<16x1xf32> to vector<16x32xf32>
    %92 = arith.subf %86, %91 : vector<16x32xf32>
    %93 = arith.mulf %92, %92 : vector<16x32xf32>
    %cst_39 = arith.constant dense<0.000000e+00> : vector<16xf32>
    %94 = vector.multi_reduction <add>, %93, %cst_39 [1] : vector<16x32xf32> to vector<16xf32>
    %95 = vector.shape_cast %94 : vector<16xf32> to vector<16x1xf32>
    %cst_40 = arith.constant 3.200000e+01 : f32
    %96 = vector.broadcast %cst_40 : f32 to vector<16x1xf32>
    %97 = arith.divf %95, %96 : vector<16x1xf32>
    %98 = vector.broadcast %90 : vector<16x1xf32> to vector<16x32xf32>
    %99 = arith.subf %86, %98 : vector<16x32xf32>
    %cst_41 = arith.constant 9.99999974E-6 : f32
    %100 = vector.broadcast %cst_41 : f32 to vector<16x1xf32>
    %101 = arith.addf %97, %100 : vector<16x1xf32>
    %102 = math.rsqrt %101 : vector<16x1xf32>
    %103 = vector.broadcast %102 : vector<16x1xf32> to vector<16x32xf32>
    %104 = arith.mulf %99, %103 : vector<16x32xf32>
    %105 = vector.broadcast %8 : vector<1x32xf32> to vector<16x32xf32>
    %106 = arith.mulf %104, %105 : vector<16x32xf32>
    %107 = vector.broadcast %9 : vector<1x32xf32> to vector<16x32xf32>
    %108 = arith.addf %106, %107 : vector<16x32xf32>
    %109 = arith.truncf %108 : vector<16x32xf32> to vector<16x32xbf16>
    %c0_42 = arith.constant 0 : index
    %c0_43 = arith.constant 0 : index
    %c0_44 = arith.constant 0 : index
    %110 = vector.load %arg5[%c0_42, %c0_43, %c0_44] : memref<2x32x64xbf16, #tpu.memory_space<vmem>>, vector<1x32x64xbf16>
    %111 = vector.shape_cast %110 : vector<1x32x64xbf16> to vector<32x64xbf16>
    %cst_45 = arith.constant dense<0.000000e+00> : vector<16x64xf32>
    %112 = tpu.matmul %109, %111, %cst_45 {dimension_numbers = #tpu.dot_dimension_numbers<[1], [0], [0], [1], [0, 0, 1, 1], [], []>} : vector<16x32xbf16>, vector<32x64xbf16>, vector<16x64xf32> -> vector<16x64xf32>
    %c0_46 = arith.constant 0 : index
    %c0_47 = arith.constant 0 : index
    %c0_48 = arith.constant 0 : index
    %113 = vector.load %arg6[%c0_46, %c0_47, %c0_48] : memref<2x1x64xf32, #tpu.memory_space<vmem>>, vector<1x1x64xf32>
    %114 = vector.shape_cast %113 : vector<1x1x64xf32> to vector<1x64xf32>
    %115 = vector.broadcast %114 : vector<1x64xf32> to vector<16x64xf32>
    %116 = arith.addf %112, %115 : vector<16x64xf32>
    %cst_49 = arith.constant 0.000000e+00 : f32
    %117 = vector.broadcast %cst_49 : f32 to vector<16x64xf32>
    %118 = arith.maximumf %116, %117 : vector<16x64xf32>
    %119 = arith.truncf %118 : vector<16x64xf32> to vector<16x64xbf16>
    %c0_50 = arith.constant 0 : index
    %c0_51 = arith.constant 0 : index
    %c0_52 = arith.constant 0 : index
    %120 = vector.load %arg7[%c0_50, %c0_51, %c0_52] : memref<2x64x32xbf16, #tpu.memory_space<vmem>>, vector<1x64x32xbf16>
    %121 = vector.shape_cast %120 : vector<1x64x32xbf16> to vector<64x32xbf16>
    %cst_53 = arith.constant dense<0.000000e+00> : vector<16x32xf32>
    %122 = tpu.matmul %119, %121, %cst_53 {dimension_numbers = #tpu.dot_dimension_numbers<[1], [0], [0], [1], [0, 0, 1, 1], [], []>} : vector<16x64xbf16>, vector<64x32xbf16>, vector<16x32xf32> -> vector<16x32xf32>
    %123 = vector.broadcast %10 : vector<1x32xf32> to vector<16x32xf32>
    %124 = arith.addf %122, %123 : vector<16x32xf32>
    %125 = arith.addf %108, %124 : vector<16x32xf32>
    %cst_54 = arith.constant dense<0.000000e+00> : vector<16xf32>
    %126 = vector.multi_reduction <add>, %125, %cst_54 [1] : vector<16x32xf32> to vector<16xf32>
    %127 = vector.shape_cast %126 : vector<16xf32> to vector<16x1xf32>
    %cst_55 = arith.constant 3.200000e+01 : f32
    %128 = vector.broadcast %cst_55 : f32 to vector<16x1xf32>
    %129 = arith.divf %127, %128 : vector<16x1xf32>
    %130 = vector.broadcast %129 : vector<16x1xf32> to vector<16x32xf32>
    %131 = arith.subf %125, %130 : vector<16x32xf32>
    %132 = arith.mulf %131, %131 : vector<16x32xf32>
    %cst_56 = arith.constant dense<0.000000e+00> : vector<16xf32>
    %133 = vector.multi_reduction <add>, %132, %cst_56 [1] : vector<16x32xf32> to vector<16xf32>
    %134 = vector.shape_cast %133 : vector<16xf32> to vector<16x1xf32>
    %cst_57 = arith.constant 3.200000e+01 : f32
    %135 = vector.broadcast %cst_57 : f32 to vector<16x1xf32>
    %136 = arith.divf %134, %135 : vector<16x1xf32>
    %137 = vector.broadcast %129 : vector<16x1xf32> to vector<16x32xf32>
    %138 = arith.subf %125, %137 : vector<16x32xf32>
    %cst_58 = arith.constant 9.99999974E-6 : f32
    %139 = vector.broadcast %cst_58 : f32 to vector<16x1xf32>
    %140 = arith.addf %136, %139 : vector<16x1xf32>
    %141 = math.rsqrt %140 : vector<16x1xf32>
    %142 = vector.broadcast %141 : vector<16x1xf32> to vector<16x32xf32>
    %143 = arith.mulf %138, %142 : vector<16x32xf32>
    %144 = vector.broadcast %11 : vector<1x32xf32> to vector<16x32xf32>
    %145 = arith.mulf %143, %144 : vector<16x32xf32>
    %146 = vector.broadcast %12 : vector<1x32xf32> to vector<16x32xf32>
    %147 = arith.addf %145, %146 : vector<16x32xf32>
    %c1_59 = arith.constant 1 : index
    %c0_60 = arith.constant 0 : index
    %c0_61 = arith.constant 0 : index
    %148 = vector.load %arg10[%c1_59, %c0_60, %c0_61] : memref<2x16x32xf32, #tpu.memory_space<vmem>>, vector<1x16x32xf32>
    %149 = vector.shape_cast %148 : vector<1x16x32xf32> to vector<16x32xf32>
    %150 = vector.shape_cast %147 : vector<16x32xf32> to vector<1x16x32xf32>
    tpu.vector_store %arg10[%c1_59, %c0_60, %c0_61], %150 {strides = array<i32>} : memref<2x16x32xf32, #tpu.memory_space<vmem>>, vector<1x16x32xf32>,
    %c1_62 = arith.constant 1 : index
    %c0_63 = arith.constant 0 : index
    %c0_64 = arith.constant 0 : index
    %151 = vector.load %arg8[%c1_62, %c0_63, %c0_64] : memref<2x6x32xf32, #tpu.memory_space<vmem>>, vector<1x6x32xf32>
    %152 = vector.shape_cast %151 : vector<1x6x32xf32> to vector<6x32xf32>
    %153 = vector.extract_strided_slice %152 {offsets = [0, 0], sizes = [1, 32], strides = [1, 1]} : vector<6x32xf32> to vector<1x32xf32>
    %154 = vector.extract_strided_slice %152 {offsets = [1, 0], sizes = [1, 32], strides = [1, 1]} : vector<6x32xf32> to vector<1x32xf32>
    %155 = vector.extract_strided_slice %152 {offsets = [2, 0], sizes = [1, 32], strides = [1, 1]} : vector<6x32xf32> to vector<1x32xf32>
    %156 = vector.extract_strided_slice %152 {offsets = [3, 0], sizes = [1, 32], strides = [1, 1]} : vector<6x32xf32> to vector<1x32xf32>
    %157 = vector.extract_strided_slice %152 {offsets = [4, 0], sizes = [1, 32], strides = [1, 1]} : vector<6x32xf32> to vector<1x32xf32>
    %158 = vector.extract_strided_slice %152 {offsets = [5, 0], sizes = [1, 32], strides = [1, 1]} : vector<6x32xf32> to vector<1x32xf32>
    %159 = arith.truncf %147 : vector<16x32xf32> to vector<16x32xbf16>
    %c1_65 = arith.constant 1 : index
    %c0_66 = arith.constant 0 : index
    %c0_67 = arith.constant 0 : index
    %160 = vector.load %arg2[%c1_65, %c0_66, %c0_67] : memref<2x32x96xbf16, #tpu.memory_space<vmem>>, vector<1x32x96xbf16>
    %161 = vector.shape_cast %160 : vector<1x32x96xbf16> to vector<32x96xbf16>
    %cst_68 = arith.constant dense<0.000000e+00> : vector<16x96xf32>
    %162 = tpu.matmul %159, %161, %cst_68 {dimension_numbers = #tpu.dot_dimension_numbers<[1], [0], [0], [1], [0, 0, 1, 1], [], []>} : vector<16x32xbf16>, vector<32x96xbf16>, vector<16x96xf32> -> vector<16x96xf32>
    %c1_69 = arith.constant 1 : index
    %c0_70 = arith.constant 0 : index
    %c0_71 = arith.constant 0 : index
    %163 = vector.load %arg3[%c1_69, %c0_70, %c0_71] : memref<2x1x96xf32, #tpu.memory_space<vmem>>, vector<1x1x96xf32>
    %164 = vector.shape_cast %163 : vector<1x1x96xf32> to vector<1x96xf32>
    %165 = vector.broadcast %164 : vector<1x96xf32> to vector<16x96xf32>
    %166 = arith.addf %162, %165 : vector<16x96xf32>
    %167 = vector.extract_strided_slice %166 {offsets = [0, 0], sizes = [16, 16], strides = [1, 1]} : vector<16x96xf32> to vector<16x16xf32>
    %168 = vector.shape_cast %167 : vector<16x16xf32> to vector<2x8x16xf32>
    %169 = vector.extract_strided_slice %166 {offsets = [0, 32], sizes = [16, 16], strides = [1, 1]} : vector<16x96xf32> to vector<16x16xf32>
    %170 = vector.shape_cast %169 : vector<16x16xf32> to vector<2x8x16xf32>
    %171 = vector.extract_strided_slice %166 {offsets = [0, 64], sizes = [16, 16], strides = [1, 1]} : vector<16x96xf32> to vector<16x16xf32>
    %172 = vector.shape_cast %171 : vector<16x16xf32> to vector<2x8x16xf32>
    %173 = arith.truncf %168 : vector<2x8x16xf32> to vector<2x8x16xbf16>
    %174 = arith.truncf %170 : vector<2x8x16xf32> to vector<2x8x16xbf16>
    "tpu.trace_start"() <{level = 10 : i32, message = "bqd,bkd->bqk"}> : () -> ()
    %cst_72 = arith.constant dense<0.000000e+00> : vector<2x8x8xf32>
    %175 = tpu.matmul %173, %174, %cst_72 {dimension_numbers = #tpu.dot_dimension_numbers<[2], [2], [1], [1], [0, 0, 0, 1, 1, 1], [0], [0]>} : vector<2x8x16xbf16>, vector<2x8x16xbf16>, vector<2x8x8xf32> -> vector<2x8x8xf32>
    "tpu.trace_stop"() : () -> ()
    %cst_73 = arith.constant 2.500000e-01 : f32
    %176 = vector.broadcast %cst_73 : f32 to vector<2x8x8xf32>
    %177 = arith.mulf %175, %176 : vector<2x8x8xf32>
    %178 = arith.addf %177, %1 : vector<2x8x8xf32>
    %cst_74 = arith.constant dense<0xFF800000> : vector<2x8xf32>
    %179 = vector.multi_reduction <maximumf>, %178, %cst_74 [2] : vector<2x8x8xf32> to vector<2x8xf32>
    %180 = vector.shape_cast %179 : vector<2x8xf32> to vector<2x8x1xf32>
    %181 = vector.broadcast %180 : vector<2x8x1xf32> to vector<2x8x8xf32>
    %182 = arith.subf %178, %181 : vector<2x8x8xf32>
    %183 = math.exp %182 : vector<2x8x8xf32>
    %cst_75 = arith.constant dense<0.000000e+00> : vector<2x8xf32>
    %184 = vector.multi_reduction <add>, %183, %cst_75 [2] : vector<2x8x8xf32> to vector<2x8xf32>
    %185 = vector.shape_cast %184 : vector<2x8xf32> to vector<2x8x1xf32>
    %186 = tpu.reciprocal %185 {approx = true} : vector<2x8x1xf32> -> vector<2x8x1xf32>
    %187 = vector.broadcast %186 : vector<2x8x1xf32> to vector<2x8x8xf32>
    %188 = arith.mulf %183, %187 : vector<2x8x8xf32>
    %c2 = arith.constant 2 : index
    %c0_76 = arith.constant 0 : index
    %c0_77 = arith.constant 0 : index
    %c0_78 = arith.constant 0 : index
    %189 = vector.load %arg11[%c2, %c0_76, %c0_77, %c0_78] : memref<4x2x8x8xf32, #tpu.memory_space<vmem>>, vector<1x2x8x8xf32>
    %190 = vector.shape_cast %189 : vector<1x2x8x8xf32> to vector<2x8x8xf32>
    %191 = vector.shape_cast %188 : vector<2x8x8xf32> to vector<1x2x8x8xf32>
    tpu.vector_store %arg11[%c2, %c0_76, %c0_77, %c0_78], %191 {strides = array<i32>} : memref<4x2x8x8xf32, #tpu.memory_space<vmem>>, vector<1x2x8x8xf32>,
    %192 = arith.truncf %188 : vector<2x8x8xf32> to vector<2x8x8xbf16>
    %193 = arith.truncf %172 : vector<2x8x16xf32> to vector<2x8x16xbf16>
    "tpu.trace_start"() <{level = 10 : i32, message = "bqk,bkd->bqd"}> : () -> ()
    %cst_79 = arith.constant dense<0.000000e+00> : vector<2x8x16xf32>
    %194 = tpu.matmul %192, %193, %cst_79 {dimension_numbers = #tpu.dot_dimension_numbers<[2], [1], [1], [2], [0, 0, 0, 1, 1, 2], [0], [0]>} : vector<2x8x8xbf16>, vector<2x8x16xbf16>, vector<2x8x16xf32> -> vector<2x8x16xf32>
    "tpu.trace_stop"() : () -> ()
    %195 = vector.shape_cast %194 : vector<2x8x16xf32> to vector<16x16xf32>
    %196 = vector.extract_strided_slice %166 {offsets = [0, 16], sizes = [16, 16], strides = [1, 1]} : vector<16x96xf32> to vector<16x16xf32>
    %197 = vector.shape_cast %196 : vector<16x16xf32> to vector<2x8x16xf32>
    %198 = vector.extract_strided_slice %166 {offsets = [0, 48], sizes = [16, 16], strides = [1, 1]} : vector<16x96xf32> to vector<16x16xf32>
    %199 = vector.shape_cast %198 : vector<16x16xf32> to vector<2x8x16xf32>
    %200 = vector.extract_strided_slice %166 {offsets = [0, 80], sizes = [16, 16], strides = [1, 1]} : vector<16x96xf32> to vector<16x16xf32>
    %201 = vector.shape_cast %200 : vector<16x16xf32> to vector<2x8x16xf32>
    %202 = arith.truncf %197 : vector<2x8x16xf32> to vector<2x8x16xbf16>
    %203 = arith.truncf %199 : vector<2x8x16xf32> to vector<2x8x16xbf16>
    "tpu.trace_start"() <{level = 10 : i32, message = "bqd,bkd->bqk"}> : () -> ()
    %cst_80 = arith.constant dense<0.000000e+00> : vector<2x8x8xf32>
    %204 = tpu.matmul %202, %203, %cst_80 {dimension_numbers = #tpu.dot_dimension_numbers<[2], [2], [1], [1], [0, 0, 0, 1, 1, 1], [0], [0]>} : vector<2x8x16xbf16>, vector<2x8x16xbf16>, vector<2x8x8xf32> -> vector<2x8x8xf32>
    "tpu.trace_stop"() : () -> ()
    %cst_81 = arith.constant 2.500000e-01 : f32
    %205 = vector.broadcast %cst_81 : f32 to vector<2x8x8xf32>
    %206 = arith.mulf %204, %205 : vector<2x8x8xf32>
    %207 = arith.addf %206, %1 : vector<2x8x8xf32>
    %cst_82 = arith.constant dense<0xFF800000> : vector<2x8xf32>
    %208 = vector.multi_reduction <maximumf>, %207, %cst_82 [2] : vector<2x8x8xf32> to vector<2x8xf32>
    %209 = vector.shape_cast %208 : vector<2x8xf32> to vector<2x8x1xf32>
    %210 = vector.broadcast %209 : vector<2x8x1xf32> to vector<2x8x8xf32>
    %211 = arith.subf %207, %210 : vector<2x8x8xf32>
    %212 = math.exp %211 : vector<2x8x8xf32>
    %cst_83 = arith.constant dense<0.000000e+00> : vector<2x8xf32>
    %213 = vector.multi_reduction <add>, %212, %cst_83 [2] : vector<2x8x8xf32> to vector<2x8xf32>
    %214 = vector.shape_cast %213 : vector<2x8xf32> to vector<2x8x1xf32>
    %215 = tpu.reciprocal %214 {approx = true} : vector<2x8x1xf32> -> vector<2x8x1xf32>
    %216 = vector.broadcast %215 : vector<2x8x1xf32> to vector<2x8x8xf32>
    %217 = arith.mulf %212, %216 : vector<2x8x8xf32>
    %c3 = arith.constant 3 : index
    %c0_84 = arith.constant 0 : index
    %c0_85 = arith.constant 0 : index
    %c0_86 = arith.constant 0 : index
    %218 = vector.load %arg11[%c3, %c0_84, %c0_85, %c0_86] : memref<4x2x8x8xf32, #tpu.memory_space<vmem>>, vector<1x2x8x8xf32>
    %219 = vector.shape_cast %218 : vector<1x2x8x8xf32> to vector<2x8x8xf32>
    %220 = vector.shape_cast %217 : vector<2x8x8xf32> to vector<1x2x8x8xf32>
    tpu.vector_store %arg11[%c3, %c0_84, %c0_85, %c0_86], %220 {strides = array<i32>} : memref<4x2x8x8xf32, #tpu.memory_space<vmem>>, vector<1x2x8x8xf32>,
    %221 = arith.truncf %217 : vector<2x8x8xf32> to vector<2x8x8xbf16>
    %222 = arith.truncf %201 : vector<2x8x16xf32> to vector<2x8x16xbf16>
    "tpu.trace_start"() <{level = 10 : i32, message = "bqk,bkd->bqd"}> : () -> ()
    %cst_87 = arith.constant dense<0.000000e+00> : vector<2x8x16xf32>
    %223 = tpu.matmul %221, %222, %cst_87 {dimension_numbers = #tpu.dot_dimension_numbers<[2], [1], [1], [2], [0, 0, 0, 1, 1, 2], [0], [0]>} : vector<2x8x8xbf16>, vector<2x8x16xbf16>, vector<2x8x16xf32> -> vector<2x8x16xf32>
    "tpu.trace_stop"() : () -> ()
    %224 = vector.shape_cast %223 : vector<2x8x16xf32> to vector<16x16xf32>
    %225 = tpu.concatenate %195, %224 in 1 : vector<16x16xf32>, vector<16x16xf32> -> vector<16x32xf32>
    %226 = arith.truncf %225 : vector<16x32xf32> to vector<16x32xbf16>
    %c1_88 = arith.constant 1 : index
    %c0_89 = arith.constant 0 : index
    %c0_90 = arith.constant 0 : index
    %227 = vector.load %arg4[%c1_88, %c0_89, %c0_90] : memref<2x32x32xbf16, #tpu.memory_space<vmem>>, vector<1x32x32xbf16>
    %228 = vector.shape_cast %227 : vector<1x32x32xbf16> to vector<32x32xbf16>
    %cst_91 = arith.constant dense<0.000000e+00> : vector<16x32xf32>
    %229 = tpu.matmul %226, %228, %cst_91 {dimension_numbers = #tpu.dot_dimension_numbers<[1], [0], [0], [1], [0, 0, 1, 1], [], []>} : vector<16x32xbf16>, vector<32x32xbf16>, vector<16x32xf32> -> vector<16x32xf32>
    %230 = vector.broadcast %153 : vector<1x32xf32> to vector<16x32xf32>
    %231 = arith.addf %229, %230 : vector<16x32xf32>
    %232 = arith.addf %147, %231 : vector<16x32xf32>
    %cst_92 = arith.constant dense<0.000000e+00> : vector<16xf32>
    %233 = vector.multi_reduction <add>, %232, %cst_92 [1] : vector<16x32xf32> to vector<16xf32>
    %234 = vector.shape_cast %233 : vector<16xf32> to vector<16x1xf32>
    %cst_93 = arith.constant 3.200000e+01 : f32
    %235 = vector.broadcast %cst_93 : f32 to vector<16x1xf32>
    %236 = arith.divf %234, %235 : vector<16x1xf32>
    %237 = vector.broadcast %236 : vector<16x1xf32> to vector<16x32xf32>
    %238 = arith.subf %232, %237 : vector<16x32xf32>
    %239 = arith.mulf %238, %238 : vector<16x32xf32>
    %cst_94 = arith.constant dense<0.000000e+00> : vector<16xf32>
    %240 = vector.multi_reduction <add>, %239, %cst_94 [1] : vector<16x32xf32> to vector<16xf32>
    %241 = vector.shape_cast %240 : vector<16xf32> to vector<16x1xf32>
    %cst_95 = arith.constant 3.200000e+01 : f32
    %242 = vector.broadcast %cst_95 : f32 to vector<16x1xf32>
    %243 = arith.divf %241, %242 : vector<16x1xf32>
    %244 = vector.broadcast %236 : vector<16x1xf32> to vector<16x32xf32>
    %245 = arith.subf %232, %244 : vector<16x32xf32>
    %cst_96 = arith.constant 9.99999974E-6 : f32
    %246 = vector.broadcast %cst_96 : f32 to vector<16x1xf32>
    %247 = arith.addf %243, %246 : vector<16x1xf32>
    %248 = math.rsqrt %247 : vector<16x1xf32>
    %249 = vector.broadcast %248 : vector<16x1xf32> to vector<16x32xf32>
    %250 = arith.mulf %245, %249 : vector<16x32xf32>
    %251 = vector.broadcast %154 : vector<1x32xf32> to vector<16x32xf32>
    %252 = arith.mulf %250, %251 : vector<16x32xf32>
    %253 = vector.broadcast %155 : vector<1x32xf32> to vector<16x32xf32>
    %254 = arith.addf %252, %253 : vector<16x32xf32>
    %255 = arith.truncf %254 : vector<16x32xf32> to vector<16x32xbf16>
    %c1_97 = arith.constant 1 : index
    %c0_98 = arith.constant 0 : index
    %c0_99 = arith.constant 0 : index
    %256 = vector.load %arg5[%c1_97, %c0_98, %c0_99] : memref<2x32x64xbf16, #tpu.memory_space<vmem>>, vector<1x32x64xbf16>
    %257 = vector.shape_cast %256 : vector<1x32x64xbf16> to vector<32x64xbf16>
    %cst_100 = arith.constant dense<0.000000e+00> : vector<16x64xf32>
    %258 = tpu.matmul %255, %257, %cst_100 {dimension_numbers = #tpu.dot_dimension_numbers<[1], [0], [0], [1], [0, 0, 1, 1], [], []>} : vector<16x32xbf16>, vector<32x64xbf16>, vector<16x64xf32> -> vector<16x64xf32>
    %c1_101 = arith.constant 1 : index
    %c0_102 = arith.constant 0 : index
    %c0_103 = arith.constant 0 : index
    %259 = vector.load %arg6[%c1_101, %c0_102, %c0_103] : memref<2x1x64xf32, #tpu.memory_space<vmem>>, vector<1x1x64xf32>
    %260 = vector.shape_cast %259 : vector<1x1x64xf32> to vector<1x64xf32>
    %261 = vector.broadcast %260 : vector<1x64xf32> to vector<16x64xf32>
    %262 = arith.addf %258, %261 : vector<16x64xf32>
    %cst_104 = arith.constant 0.000000e+00 : f32
    %263 = vector.broadcast %cst_104 : f32 to vector<16x64xf32>
    %264 = arith.maximumf %262, %263 : vector<16x64xf32>
    %265 = arith.truncf %264 : vector<16x64xf32> to vector<16x64xbf16>
    %c1_105 = arith.constant 1 : index
    %c0_106 = arith.constant 0 : index
    %c0_107 = arith.constant 0 : index
    %266 = vector.load %arg7[%c1_105, %c0_106, %c0_107] : memref<2x64x32xbf16, #tpu.memory_space<vmem>>, vector<1x64x32xbf16>
    %267 = vector.shape_cast %266 : vector<1x64x32xbf16> to vector<64x32xbf16>
    %cst_108 = arith.constant dense<0.000000e+00> : vector<16x32xf32>
    %268 = tpu.matmul %265, %267, %cst_108 {dimension_numbers = #tpu.dot_dimension_numbers<[1], [0], [0], [1], [0, 0, 1, 1], [], []>} : vector<16x64xbf16>, vector<64x32xbf16>, vector<16x32xf32> -> vector<16x32xf32>
    %269 = vector.broadcast %156 : vector<1x32xf32> to vector<16x32xf32>
    %270 = arith.addf %268, %269 : vector<16x32xf32>
    %271 = arith.addf %254, %270 : vector<16x32xf32>
    %cst_109 = arith.constant dense<0.000000e+00> : vector<16xf32>
    %272 = vector.multi_reduction <add>, %271, %cst_109 [1] : vector<16x32xf32> to vector<16xf32>
    %273 = vector.shape_cast %272 : vector<16xf32> to vector<16x1xf32>
    %cst_110 = arith.constant 3.200000e+01 : f32
    %274 = vector.broadcast %cst_110 : f32 to vector<16x1xf32>
    %275 = arith.divf %273, %274 : vector<16x1xf32>
    %276 = vector.broadcast %275 : vector<16x1xf32> to vector<16x32xf32>
    %277 = arith.subf %271, %276 : vector<16x32xf32>
    %278 = arith.mulf %277, %277 : vector<16x32xf32>
    %cst_111 = arith.constant dense<0.000000e+00> : vector<16xf32>
    %279 = vector.multi_reduction <add>, %278, %cst_111 [1] : vector<16x32xf32> to vector<16xf32>
    %280 = vector.shape_cast %279 : vector<16xf32> to vector<16x1xf32>
    %cst_112 = arith.constant 3.200000e+01 : f32
    %281 = vector.broadcast %cst_112 : f32 to vector<16x1xf32>
    %282 = arith.divf %280, %281 : vector<16x1xf32>
    %283 = vector.broadcast %275 : vector<16x1xf32> to vector<16x32xf32>
    %284 = arith.subf %271, %283 : vector<16x32xf32>
    %cst_113 = arith.constant 9.99999974E-6 : f32
    %285 = vector.broadcast %cst_113 : f32 to vector<16x1xf32>
    %286 = arith.addf %282, %285 : vector<16x1xf32>
    %287 = math.rsqrt %286 : vector<16x1xf32>
    %288 = vector.broadcast %287 : vector<16x1xf32> to vector<16x32xf32>
    %289 = arith.mulf %284, %288 : vector<16x32xf32>
    %290 = vector.broadcast %157 : vector<1x32xf32> to vector<16x32xf32>
    %291 = arith.mulf %289, %290 : vector<16x32xf32>
    %292 = vector.broadcast %158 : vector<1x32xf32> to vector<16x32xf32>
    %293 = arith.addf %291, %292 : vector<16x32xf32>
    %c0_114 = arith.constant 0 : index
    %c0_115 = arith.constant 0 : index
    %294 = vector.load %arg9[%c0_114, %c0_115] : memref<16x32xf32, #tpu.memory_space<vmem>>, vector<16x32xf32>
    tpu.vector_store %arg9[%c0_114, %c0_115], %293 {strides = array<i32>} : memref<16x32xf32, #tpu.memory_space<vmem>>, vector<16x32xf32>,
    return
  }
}

</mosaic_0001>

<bundles_post_ra>
// kernel: encoder_network_forward.1
= control target key start
LH: loop header
LB: loop body
LE: loop exit
PB: predicated region body
PF: predicated region fallthrough
CT: control target
= control target key end

     0   :  { %v2162_v1 = vmov 0.0   ;;  %vm2163_vm0 = vmmov 0   ;;  %vm41_vm1 = vcmask 261120   ;;  %s2691_s0 = inlined_call_operand.vmem [shape: f32[16,32], index: 0, kind: input, shape index: {}]   ;;  %s2692_s1 = inlined_call_operand.vmem [shape: f32[2,8,8], index: 1, kind: input, shape index: {}]   ;;  %s2693_s2 = inlined_call_operand.vmem [shape: bf16[2,32,96], index: 2, kind: input, shape index: {}]   ;;  %s2694_s3 = inlined_call_operand.vmem [shape: f32[2,1,96], index: 3, kind: input, shape index: {}]   ;;  %s2695_s4 = inlined_call_operand.vmem [shape: bf16[2,32,32], index: 4, kind: input, shape index: {}]   ;;  %s2696_s5 = inlined_call_operand.vmem [shape: bf16[2,32,64], index: 5, kind: input, shape index: {}]   ;;  %s2697_s6 = inlined_call_operand.vmem [shape: f32[2,1,64], index: 6, kind: input, shape index: {}]   ;;  %s2698_s7 = inlined_call_operand.vmem [shape: bf16[2,64,32], index: 7, kind: input, shape index: {}]   ;;  %s2699_s8 = inlined_call_operand.vmem [shape: f32[2,6,32], index: 8, kind: input, shape index: {}]   ;;  %s2700_s9 = inlined_call_operand.hbm [shape: f32[16,32], index: 9, kind: output, shape index: {0}]   ;;  %s2701_s10 = inlined_call_operand.vmem [shape: f32[2,16,32], index: 10, kind: output, shape index: {1}]   ;;  %s2702_s11 = inlined_call_operand.vmem [shape: f32[4,2,8,8], index: 11, kind: output, shape index: {2}]  }
   0x1   :  { %v2070_v0 = vld [vmem:[%s2693_s2] sm:$0xff]   ;;  %1881 = vmatprep.subr.bf16.mxu1 %v2162_v1  ;;  %1895 = vmatprep.subr.bf16.mxu0 %v2162_v1  ;;  %v2071_v2 = vld [vmem:[%s2693_s2 + $0x8] sm:$0xff]  }
   0x2   :  { %1882 = vmatpush3.bf16.msra.mxu1 %v2070_v0  ;;  %1885 = vmatprep.mubr.msk.bf16.mxu1 %vm2163_vm0, %v2162_v1  ;;  %v2246_v3 = vld [vmem:[%s2691_s0] sm:$0xff]  ;;  %v2251_v4 = vld [vmem:[%s2691_s0 + $0x8] sm:$0xff] }
   0x3   :  { %1883 = vmatprep.subr.bf16.mxu1 %v2162_v1  ;;  %42 = vst.msk [vmem:[%s2701_s10] sm:$0xff] %vm41_vm1, %v2246_v3  ;;  %43 = vst.msk [vmem:[%s2701_s10 + $0x8] sm:$0xff] %vm41_vm1, %v2251_v4  ;;  %1897 = vmatprep.mubr.msk.bf16.mxu0 %vm2163_vm0, %v2162_v1  ;;  %v45_v5 = vpack.c.bf16 %v2251_v4, %v2246_v3 }
   0x6   :  { %1884 = vmatpush3.bf16.msra.mxu1 %v2071_v2 }
   0x7   :  { %1889 = vmatprep.subr.bf16.mxu1 %v2162_v1 }
   0x9   :  { %1886 = vmatmul.mubr.msk.bf16.vlgmr.msra.gmra.mrb[0].mxu1 %vm41_vm1, %v45_v5 }
   0xa   :  { %1891 = vmatprep.mubr.msk.bf16.mxu1 %vm2163_vm0, %v2162_v1 }
   0xb   :  { %17 = vsyncpa [#allocation3], 0  ;;  %v1742_v6 = vld [vmem:[%s2694_s3] ss:$0 sm:$0xff]  ;;  %s2164_s30 = smov 96   ;;  %vm118_vm2 = vcmask 130048  }
   0xc   :  { %v2298_v20 = vld [vmem:[%s2692_s1] sm:$0xff]  ;;  %vm218_vm3 = vcmask 64512   ;;  %v2304_v27 = vld [vmem:[%s2692_s1 + $0x8] sm:$0xff]  ;;  %s2165_s16 = smov 64   ;;  %s2166_s1 = smov 80   ;;  %vm250_vm4 = vcmask 1043456  }
   0xd   :  { %s2167_s17 = smov 112   ;;  %s2168_s22 = smov 48   ;;  %vm792_vm5 = vcmask 523264  }
   0xe   :  { %s2169_s12 = smov 16  }
  0xdc   :  { %v106_v7 = vpop.f32.mrb[0].mxu1 }
  0xdd   :  { %v107_v8 = vadd.f32 %v1742_v6, %v106_v7  ;;  %v1887_v9 = vpop.f32.mrb[1].mxu1 }
  0xde   :  { %v109_v10 = vpop.f32.mrb[2].mxu1 }
  0xdf   :  { %v2275_v11 = vpack.c.bf16 %v107_v8, %v107_v8  ;;  %v110_v12 = vadd.f32 %v1742_v6, %v109_v10  ;;  %v1888_v13 = vpop.f32.mrb[3].mxu1 }
  0xe1   :  { %116 = vrot.lane.b32.xlu0 %v2275_v11, %s2164_s30  ;;  %v2279_v14 = vpack.c.bf16 %v110_v12, %v110_v12 }
  0xe5   :  { %166 = vrot.lane.b32.xlu0 %v2279_v14, %s2164_s30 }
 0x153   :  { %v117_v15 = vpop.permute.xlu0 %116 }
 0x154   :  { %v123_v16 = vsel %vm118_vm2, %v117_v15, 0 }
 0x155   :  { %1890 = vmatpush3.bf16.xpose.msra.mxu1 %v123_v16 }
 0x156   :  { %1901 = vmatprep.subr.bf16.mxu1 %v2162_v1 }
 0x157   :  { %v167_v17 = vpop.permute.xlu0 %166 }
 0x158   :  { %v172_v18 = vsel %vm118_vm2, %v167_v17, 0 }
 0x159   :  { %1896 = vmatpush3.bf16.xpose.msra.mxu0 %v172_v18 }
 0x15a   :  { %1907 = vmatprep.subr.bf16.mxu0 %v2162_v1 }
 0x15c   :  { %1892 = vmatmul.mubr.msk.bf16.vlgmr.msra.gmra.mrb[4].mxu1 %vm118_vm2, %v2275_v11 }
 0x15d   :  { %1903 = vmatprep.mubr.msk.bf16.mxu1 %vm2163_vm0, %v2162_v1 }
 0x160   :  { %1898 = vmatmul.mubr.msk.bf16.vlgmr.msra.gmra.mrb[0].mxu0 %vm118_vm2, %v2279_v14 }
 0x161   :  { %1909 = vmatprep.mubr.msk.bf16.mxu0 %vm2163_vm0, %v2162_v1 }
 0x22f   :  { %v159_v19 = vpop.f32.mrb[4].mxu1 }
 0x230   :  { %v214_v21 = vmul.f32 0.25, %v159_v19  ;;  %v1893_v22 = vpop.f32.mrb[5].mxu1 }
 0x231   :  { %v162_v23 = vpop.f32.mrb[6].mxu1 }
 0x232   :  { %v1894_v24 = vpop.f32.mrb[7].mxu1  ;;  %v216_v25 = vadd.f32 %v214_v21, %v2298_v20 }
 0x233   :  { %v208_v26 = vpop.f32.mrb[0].mxu0 }
 0x234   :  { %v215_v28 = vmul.f32 0.25, %v208_v26  ;;  %v1899_v29 = vpop.f32.mrb[1].mxu0  ;;  %v219_v30 = vsel %vm218_vm3, %v216_v25, -inf }
 0x235   :  { %v211_v31 = vpop.f32.mrb[2].mxu0  ;;  %220 = vmax.xlane.f32.xlu1 %v219_v30 }
 0x236   :  { %v1900_v32 = vpop.f32.mrb[3].mxu0  ;;  %v217_v33 = vadd.f32 %v215_v28, %v2304_v27 }
 0x238   :  { %v222_v34 = vsel %vm218_vm3, %v217_v33, -inf }
 0x239   :  { %223 = vmax.xlane.f32.xlu1 %v222_v34 }
 0x24a   :  { %245 = vrot.lane.b32.xlu1 %v2275_v11, %s2165_s16 }
 0x24e   :  { %294 = vrot.lane.b32.xlu1 %v2279_v14, %s2165_s16 }
 0x252   :  { %344 = vrot.lane.b32.xlu1 %v2275_v11, %s2166_s1 }
 0x2c2   :  { %v221_v35 = vpop.xlane.xlu1 %220 }
 0x2c3   :  { %v225_v36 = vsub.f32 %v216_v25, %v221_v35 }
 0x2c5   :  { %v227_v37 = vmul.f32 1.442695, %v225_v36 }
 0x2c6   :  { %v224_v38 = vpop.xlane.xlu1 %223 }
 0x2c7   :  { %2090 = vpow2.f32 %v227_v37  ;;  %v226_v39 = vsub.f32 %v217_v33, %v224_v38 }
 0x2c9   :  { %v229_v40 = vmul.f32 1.442695, %v226_v39 }
 0x2ca   :  { %v246_v41 = vpop.permute.xlu1 %245 }
 0x2cb   :  { %2092 = vpow2.f32 %v229_v40  ;;  %v252_v42 = vsel %vm250_vm4, %v246_v41, 0 }
 0x2cc   :  { %1902 = vmatpush3.bf16.msra.mxu1 %v252_v42 }
 0x2cd   :  { %1913 = vmatprep.subr.bf16.mxu1 %v2162_v1 }
 0x2ce   :  { %v295_v43 = vpop.permute.xlu1 %294 }
 0x2cf   :  { %v300_v44 = vsel %vm250_vm4, %v295_v43, 0 }
 0x2d0   :  { %1908 = vmatpush3.bf16.msra.mxu0 %v300_v44 }
 0x2d1   :  { %v2091_v45 = vpop.eup %2090  ;;  %1919 = vmatprep.subr.bf16.mxu0 %v2162_v1 }
 0x2d2   :  { %v231_v46 = vsel %vm218_vm3, %v2091_v45, 0.0  ;;  %v345_v49 = vpop.permute.xlu1 %344 }
 0x2d3   :  { %232 = vadd.xlane.f32.xlu0 %v231_v46  ;;  %v350_v56 = vsel %vm118_vm2, %v345_v49, 0  ;;  %v2073_v49 = vld [vmem:[%s2695_s4 + $0x8] sm:$0xff]  }
 0x2d5   :  { %v2093_v47 = vpop.eup %2092 }
 0x2d6   :  { %v234_v48 = vsel %vm218_vm3, %v2093_v47, 0.0 }
 0x2d7   :  { %235 = vadd.xlane.f32.xlu1 %v234_v48  ;;  %v2072_v48 = vld [vmem:[%s2695_s4] sm:$0xff]  }
 0x2e8   :  { %394 = vrot.lane.b32.xlu1 %v2279_v14, %s2166_s1 }
 0x2e9   :  { %342 = vrot.lane.b32.xlu0 %v2275_v11, %s2167_s17 }
 0x2ec   :  { %392 = vrot.lane.b32.xlu1 %v2279_v14, %s2167_s17 }
 0x360   :  { %v233_v50 = vpop.xlane.xlu0 %232 }
 0x361   :  { %2094 = vrcp.f32 %v233_v50 }
 0x364   :  { %v236_v51 = vpop.xlane.xlu1 %235  ;;  %v343_v61 = vpop.permute.xlu0 %342 }
 0x365   :  { %2096 = vrcp.f32 %v236_v51 }
 0x368   :  { %v395_v58 = vpop.permute.xlu1 %394 }
 0x369   :  { %v400_v60 = vsel %vm118_vm2, %v395_v58, 0 }
 0x36b   :  { %v2095_v52 = vpop.eup %2094 }
 0x36c   :  { %v239_v53 = vmul.f32 %v2095_v52, %v2091_v45  ;;  %v393_v62 = vpop.permute.xlu1 %392 }
 0x36e   :  { %241 = vst.msk [vmem:[%s2702_s11] sm:$0xff] %vm218_vm3, %v239_v53  ;;  %v243_v54 = vpack.c.bf16 %v239_v53, %v239_v53 }
 0x36f   :  { %v2097_v55 = vpop.eup %2096 }
 0x370   :  { %v240_v57 = vmul.f32 %v2097_v55, %v2093_v47  ;;  %1904 = vmatmul.mubr.msk.bf16.vlgmr.msra.gmra.mrb[8].mxu1 %vm218_vm3, %v243_v54 }
 0x371   :  { %1914 = vmatpush3.bf16.xpose.msra.mxu1 %v350_v56  ;;  %1915 = vmatprep.mubr.msk.bf16.mxu1 %vm2163_vm0, %v2162_v1 }
 0x372   :  { %242 = vst.msk [vmem:[%s2702_s11 + $0x8] sm:$0xff] %vm218_vm3, %v240_v57  ;;  %v244_v59 = vpack.c.bf16 %v240_v57, %v240_v57  ;;  %1925 = vmatprep.subr.bf16.mxu1 %v2162_v1 }
 0x374   :  { %1910 = vmatmul.mubr.msk.bf16.vlgmr.msra.gmra.mrb[4].mxu0 %vm218_vm3, %v244_v59 }
 0x375   :  { %1920 = vmatpush3.bf16.xpose.msra.mxu0 %v400_v60  ;;  %1921 = vmatprep.mubr.msk.bf16.mxu0 %vm2163_vm0, %v2162_v1 }
 0x376   :  { %1931 = vmatprep.subr.bf16.mxu0 %v2162_v1 }
 0x378   :  { %1916 = vmatmul.mubr.msk.bf16.vlgmr.msra.gmra.mrb[12].mxu1 %vm118_vm2, %v343_v61 }
 0x379   :  { %1927 = vmatprep.mubr.msk.bf16.mxu1 %vm2163_vm0, %v2162_v1 }
 0x37c   :  { %1922 = vmatmul.mubr.msk.bf16.vlgmr.msra.gmra.mrb[8].mxu0 %vm118_vm2, %v393_v62 }
 0x37d   :  { %1933 = vmatprep.mubr.msk.bf16.mxu0 %vm2163_vm0, %v2162_v1 }
 0x443   :  { %v2351_v63 = vpop.f32.mrb[8].mxu1 }
 0x444   :  { %v1905_v0 = vpop.f32.mrb[9].mxu1 }
 0x445   :  { %v291_v2 = vpop.f32.mrb[10].mxu1 }
 0x446   :  { %v1906_v5 = vpop.f32.mrb[11].mxu1 }
 0x447   :  { %v2353_v6 = vpop.f32.mrb[4].mxu0  ;;  %v584_v5 = vlaneseq }
 0x448   :  { %v1911_v7 = vpop.f32.mrb[5].mxu0 }
 0x449   :  { %v339_v8 = vpop.f32.mrb[6].mxu0  ;;  %v2399_v7 = vshrl.u32 %v584_v5, 7 }
 0x44a   :  { %v1912_v9 = vpop.f32.mrb[7].mxu0 }
 0x44b   :  { %v386_v10 = vpop.f32.mrb[12].mxu1  ;;  %v586_v8 = vsub.s32 0, %v2399_v7  ;;  %v2405_v9 = vld [vmem:[%s2699_s8] sm:$0x3f] }
 0x44c   :  { %v442_v12 = vmul.f32 0.25, %v386_v10  ;;  %v1917_v13 = vpop.f32.mrb[13].mxu1 }
 0x44d   :  { %v389_v15 = vpop.f32.mrb[14].mxu1 }
 0x44e   :  { %v1918_v16 = vpop.f32.mrb[15].mxu1  ;;  %v444_v17 = vadd.f32 %v442_v12, %v2298_v20 }
 0x44f   :  { %v436_v18 = vpop.f32.mrb[8].mxu0 }
 0x450   :  { %v443_v19 = vmul.f32 0.25, %v436_v18  ;;  %v1923_v21 = vpop.f32.mrb[9].mxu0  ;;  %v446_v22 = vsel %vm218_vm3, %v444_v17, -inf }
 0x451   :  { %v439_v23 = vpop.f32.mrb[10].mxu0  ;;  %447 = vmax.xlane.f32.xlu1 %v446_v22 }
 0x452   :  { %v1924_v24 = vpop.f32.mrb[11].mxu0  ;;  %v445_v25 = vadd.f32 %v443_v19, %v2304_v27 }
 0x454   :  { %v449_v26 = vsel %vm218_vm3, %v445_v25, -inf }
 0x455   :  { %450 = vmax.xlane.f32.xlu0 %v449_v26 }
 0x46b   :  { %521 = vrot.lane.b32.xlu0 %v2279_v14, %s2168_s22 }
 0x4de   :  { %v448_v28 = vpop.xlane.xlu1 %447 }
 0x4df   :  { %v452_v29 = vsub.f32 %v444_v17, %v448_v28 }
 0x4e1   :  { %v454_v30 = vmul.f32 1.442695, %v452_v29 }
 0x4e2   :  { %v451_v31 = vpop.xlane.xlu0 %450 }
 0x4e3   :  { %2098 = vpow2.f32 %v454_v30  ;;  %v453_v32 = vsub.f32 %v445_v25, %v451_v31 }
 0x4e5   :  { %v456_v33 = vmul.f32 1.442695, %v453_v32  ;;  %v2075_v32 = vld [vmem:[%s2696_s5 + $0x8] sm:$0xff]  }
 0x4e6   :  { %v522_v34 = vpop.permute.xlu0 %521 }
 0x4e7   :  { %2100 = vpow2.f32 %v456_v33  ;;  %v527_v35 = vsel %vm250_vm4, %v522_v34, 0  ;;  %v2076_v33 = vld [vmem:[%s2698_s7] sm:$0xff]   ;;  %v2077_v34 = vld [vmem:[%s2698_s7 + $0x8] sm:$0xff]  }
 0x4e8   :  { %1932 = vmatpush3.bf16.msra.mxu0 %v527_v35 }
 0x4e9   :  { %1945 = vmatprep.subr.bf16.mxu0 %v2162_v1 }
 0x4ed   :  { %v2099_v36 = vpop.eup %2098 }
 0x4ee   :  { %v458_v37 = vsel %vm218_vm3, %v2099_v36, 0.0 }
 0x4ef   :  { %459 = vadd.xlane.f32.xlu1 %v458_v37 }
 0x4f1   :  { %v2101_v38 = vpop.eup %2100 }
 0x4f2   :  { %v461_v14 = vsel %vm218_vm3, %v2101_v38, 0.0 }
 0x4f3   :  { %462 = vadd.xlane.f32.xlu1 %v461_v14 }
 0x504   :  { %473 = vrot.lane.b32.xlu1 %v2275_v11, %s2168_s22 }
 0x57c   :  { %v460_v39 = vpop.xlane.xlu1 %459 }
 0x57d   :  { %2102 = vrcp.f32 %v460_v39 }
 0x580   :  { %v463_v40 = vpop.xlane.xlu1 %462 }
 0x581   :  { %2104 = vrcp.f32 %v463_v40  ;;  %v675_v40 = vsub.s32 1, %v2399_v7 }
 0x584   :  { %v474_v41 = vpop.permute.xlu1 %473 }
 0x585   :  { %v479_v42 = vsel %vm250_vm4, %v474_v41, 0  ;;  %v676_v41 = vrot.slane %v2405_v9, %v675_v40 }
 0x586   :  { %1926 = vmatpush3.bf16.msra.mxu1 %v479_v42  ;;  %v681_v42 = vsub.s32 2, %v2399_v7 }
 0x587   :  { %v2103_v43 = vpop.eup %2102  ;;  %1937 = vmatprep.subr.bf16.mxu1 %v2162_v1 }
 0x588   :  { %v466_v44 = vmul.f32 %v2103_v43, %v2099_v36 }
 0x58a   :  { %1752 = vst.msk [vmem:[%s2702_s11 + $0x10] sm:$0xff] %vm218_vm3, %v466_v44  ;;  %v471_v45 = vpack.c.bf16 %v466_v44, %v466_v44 }
 0x58b   :  { %v2105_v46 = vpop.eup %2104 }
 0x58c   :  { %v467_v11 = vmul.f32 %v2105_v46, %v2101_v38  ;;  %1928 = vmatmul.mubr.msk.bf16.vlgmr.msra.gmra.mrb[16].mxu1 %vm218_vm3, %v471_v45 }
 0x58d   :  { %1941 = vmatprep.mubr.msk.bf16.mxu1 %vm2163_vm0, %v2162_v1  ;;  %1938 = vmatpush3.bf16.msra.mxu1 %v2072_v48 }
 0x58e   :  { %1753 = vst.msk [vmem:[%s2702_s11 + $0x18] sm:$0xff] %vm218_vm3, %v467_v11  ;;  %v472_v47 = vpack.c.bf16 %v467_v11, %v467_v11  ;;  %1939 = vmatprep.subr.bf16.mxu1 %v2162_v1 }
 0x590   :  { %1934 = vmatmul.mubr.msk.bf16.vlgmr.msra.gmra.mrb[12].mxu0 %vm218_vm3, %v472_v47  ;;  %v682_v47 = vrot.slane %v2405_v9, %v681_v42 }
 0x591   :  { %1949 = vmatprep.mubr.msk.bf16.mxu0 %vm2163_vm0, %v2162_v1  ;;  %1940 = vmatpush3.bf16.msra.mxu1 %v2073_v49 }
 0x592   :  { %1953 = vmatprep.subr.bf16.mxu1 %v2162_v1 }
 0x65f   :  { %v515_v50 = vpop.f32.mrb[16].mxu1 }
 0x660   :  { %v1929_v51 = vpop.f32.mrb[17].mxu1 }
 0x661   :  { %v518_v52 = vpop.f32.mrb[18].mxu1 }
 0x662   :  { %v1930_v53 = vpop.f32.mrb[19].mxu1  ;;  %v2078_v52 = vld [vmem:[%s2698_s7 + $0x10] sm:$0xff]  }
 0x663   :  { %v563_v54 = vpop.f32.mrb[12].mxu0  ;;  %v2079_v53 = vld [vmem:[%s2698_s7 + $0x18] sm:$0xff]  }
 0x664   :  { %v2060_v55 = vpack.i.bf16 %v563_v54, %v515_v50  ;;  %v1935_v56 = vpop.f32.mrb[13].mxu0  ;;  %v1759_v54 = vld [vmem:[%s2697_s6] ss:$0 sm:$0xff] }
 0x665   :  { %v566_v57 = vpop.f32.mrb[14].mxu0 }
 0x666   :  { %v1936_v58 = vpop.f32.mrb[15].mxu0  ;;  %2061 = vrot.lane.b32.xlu1 %v2060_v55, %s2169_s12 }
 0x6d8   :  { %v2062_v59 = vpop.permute.xlu1 %2061 }
 0x6d9   :  { %v2064_v60 = vunpack.i.h.bf16 %v2062_v59  ;;  %v2063_v61 = vunpack.i.l.bf16 %v2062_v59 }
 0x6db   :  { %v578_v62 = vsel %vm118_vm2, %v2353_v6, %v2064_v60  ;;  %v577_v0 = vsel %vm118_vm2, %v2351_v63, %v2063_v61  ;;  %v587_v63 = vrot.slane %v2405_v9, %v586_v8 }
 0x6dc   :  { %v579_v2 = vpack.c.bf16 %v578_v62, %v577_v0 }
 0x6de   :  { %1942 = vmatmul.mubr.msk.bf16.vlgmr.msra.gmra.mrb[20].mxu1 %vm41_vm1, %v579_v2  ;;  %v766_v2 = vsub.s32 3, %v2399_v7 }
 0x6df   :  { %1961 = vmatprep.mubr.msk.bf16.mxu1 %vm2163_vm0, %v2162_v1  ;;  %1954 = vmatpush3.bf16.msra.mxu1 %v2076_v33 }
 0x6e0   :  { %1955 = vmatprep.subr.bf16.mxu1 %v2162_v1  ;;  %v767_v5 = vrot.slane %v2405_v9, %v766_v2 }
 0x6e3   :  { %1956 = vmatpush3.bf16.msra.mxu1 %v2077_v34 }
 0x6e4   :  { %1957 = vmatprep.subr.bf16.mxu1 %v2162_v1 }
 0x6e7   :  { %1958 = vmatpush3.bf16.msra.mxu1 %v2078_v52 }
 0x6e8   :  { %1959 = vmatprep.subr.bf16.mxu1 %v2162_v1 }
 0x6eb   :  { %1960 = vmatpush3.bf16.msra.mxu1 %v2079_v53 }
 0x6ec   :  { %1979 = vmatprep.subr.bf16.mxu1 %v2162_v1 }
 0x7b1   :  { %v637_v6 = vpop.f32.mrb[20].mxu1 }
 0x7b2   :  { %v638_v10 = vadd.f32 %v637_v6, %v587_v63  ;;  %v1943_v12 = vpop.f32.mrb[21].mxu1 }
 0x7b3   :  { %v640_v13 = vpop.f32.mrb[22].mxu1 }
 0x7b4   :  { %v641_v15 = vadd.f32 %v640_v13, %v587_v63  ;;  %v1944_v16 = vpop.f32.mrb[23].mxu1  ;;  %v644_v17 = vadd.f32 %v638_v10, %v2246_v3 }
 0x7b6   :  { %v646_v18 = vsel %vm41_vm1, %v644_v17, 0.0  ;;  %v645_v19 = vadd.f32 %v641_v15, %v2251_v4  ;;  %v2074_v4 = vld [vmem:[%s2696_s5] sm:$0xff]  }
 0x7b7   :  { %647 = vadd.xlane.f32.xlu1 %v646_v18  ;;  %1946 = vmatpush3.bf16.msra.mxu0 %v2074_v4  ;;  %v2081_v4 = vld [vmem:[%s2693_s2 + $0x18] sm:$0xff]  }
 0x7b8   :  { %v649_v21 = vsel %vm41_vm1, %v645_v19, 0.0  ;;  %1947 = vmatprep.subr.bf16.mxu0 %v2162_v1 }
 0x7b9   :  { %650 = vadd.xlane.f32.xlu0 %v649_v21 }
 0x7bb   :  { %1948 = vmatpush3.bf16.msra.mxu0 %v2075_v32 }
 0x7bc   :  { %1965 = vmatprep.subr.bf16.mxu0 %v2162_v1 }
 0x844   :  { %v648_v22 = vpop.xlane.xlu1 %647 }
 0x845   :  { %v653_v23 = vmul.f32 0.03125, %v648_v22 }
 0x846   :  { %v651_v24 = vpop.xlane.xlu0 %650 }
 0x847   :  { %v655_v25 = vsub.f32 %v644_v17, %v653_v23  ;;  %v654_v26 = vmul.f32 0.03125, %v651_v24 }
 0x849   :  { %v656_v28 = vsub.f32 %v645_v19, %v654_v26  ;;  %v657_v29 = vmul.f32 %v655_v25, %v655_v25 }
 0x84b   :  { %v659_v30 = vsel %vm41_vm1, %v657_v29, 0.0  ;;  %v658_v31 = vmul.f32 %v656_v28, %v656_v28 }
 0x84c   :  { %660 = vadd.xlane.f32.xlu0 %v659_v30 }
 0x84d   :  { %v662_v3 = vsel %vm41_vm1, %v658_v31, 0.0 }
 0x84e   :  { %663 = vadd.xlane.f32.xlu1 %v662_v3  ;;  %v2080_v3 = vld [vmem:[%s2693_s2 + $0x10] sm:$0xff]  }
 0x8d9   :  { %v661_v35 = vpop.xlane.xlu0 %660 }
 0x8da   :  { %v665_v36 = vmul.f32 0.03125, %v661_v35 }
 0x8db   :  { %v664_v37 = vpop.xlane.xlu1 %663 }
 0x8dc   :  { %v667_v38 = vadd.f32 1e-05, %v665_v36  ;;  %v666_v14 = vmul.f32 0.03125, %v664_v37 }
 0x8de   :  { %2106 = vrsqrt.f32 %v667_v38  ;;  %v668_v39 = vadd.f32 1e-05, %v666_v14  ;;  %v867_v38 = vsub.s32 4, %v2399_v7  ;;  %v873_v14 = vsub.s32 5, %v2399_v7 }
 0x8e0   :  { %2108 = vrsqrt.f32 %v668_v39  ;;  %v868_v39 = vrot.slane %v2405_v9, %v867_v38 }
 0x8e8   :  { %v2107_v43 = vpop.eup %2106 }
 0x8e9   :  { %v671_v44 = vmul.f32 %v2107_v43, %v655_v25 }
 0x8ea   :  { %v2109_v45 = vpop.eup %2108 }
 0x8eb   :  { %v677_v46 = vmul.f32 %v676_v41, %v671_v44  ;;  %v672_v11 = vmul.f32 %v2109_v45, %v656_v28  ;;  %v874_v44 = vrot.slane %v2405_v9, %v873_v14 }
 0x8ed   :  { %v678_v48 = vmul.f32 %v676_v41, %v672_v11  ;;  %v683_v49 = vadd.f32 %v682_v47, %v677_v46 }
 0x8ef   :  { %v684_v50 = vadd.f32 %v682_v47, %v678_v48 }
 0x8f1   :  { %v685_v51 = vpack.c.bf16 %v684_v50, %v683_v49 }
 0x8f3   :  { %1950 = vmatmul.mubr.msk.bf16.vlgmr.msra.gmra.mrb[16].mxu0 %vm41_vm1, %v685_v51 }
 0x8f4   :  { %1969 = vmatprep.mubr.msk.bf16.mxu0 %vm2163_vm0, %v2162_v1  ;;  %1966 = vmatpush3.bf16.msra.mxu0 %v2080_v3 }
 0x8f5   :  { %1967 = vmatprep.subr.bf16.mxu0 %v2162_v1 }
 0x8f8   :  { %1968 = vmatpush3.bf16.msra.mxu0 %v2081_v4 }
 0x8f9   :  { %1973 = vmatprep.subr.bf16.mxu0 %v2162_v1 }
 0x9c6   :  { %v746_v55 = vpop.f32.mrb[16].mxu0 }
 0x9c7   :  { %v747_v56 = vadd.f32 %v1759_v54, %v746_v55  ;;  %v1951_v57 = vpop.f32.mrb[17].mxu0 }
 0x9c8   :  { %v749_v58 = vpop.f32.mrb[18].mxu0 }
 0x9c9   :  { %v750_v59 = vadd.f32 %v1759_v54, %v749_v58  ;;  %v1952_v60 = vpop.f32.mrb[19].mxu0  ;;  %v753_v61 = vmax.f32 %v747_v56, 0.0 }
 0x9cb   :  { %v754_v62 = vmax.f32 %v750_v59, 0.0 }
 0x9cd   :  { %v755_v0 = vpack.c.bf16 %v754_v62, %v753_v61 }
 0x9cf   :  { %1962 = vmatmul.mubr.msk.bf16.vlgmr.msra.gmra.mrb[24].mxu1 %vm792_vm5, %v755_v0 }
 0x9d0   :  { %1981 = vmatprep.mubr.msk.bf16.mxu1 %vm2163_vm0, %v2162_v1 }
 0xaa2   :  { %v830_v63 = vpop.f32.mrb[24].mxu1 }
 0xaa3   :  { %v831_v6 = vadd.f32 %v830_v63, %v767_v5  ;;  %v1963_v10 = vpop.f32.mrb[25].mxu1 }
 0xaa4   :  { %v833_v12 = vpop.f32.mrb[26].mxu1 }
 0xaa5   :  { %v834_v13 = vadd.f32 %v833_v12, %v767_v5  ;;  %v1964_v15 = vpop.f32.mrb[27].mxu1  ;;  %v837_v16 = vadd.f32 %v831_v6, %v683_v49 }
 0xaa7   :  { %v839_v17 = vsel %vm41_vm1, %v837_v16, 0.0  ;;  %v838_v18 = vadd.f32 %v834_v13, %v684_v50  ;;  %v1776_v50 = vld [vmem:[%s2694_s3 + $0x1] ss:$0 sm:$0xff] }
 0xaa8   :  { %840 = vadd.xlane.f32.xlu0 %v839_v17 }
 0xaa9   :  { %v842_v19 = vsel %vm41_vm1, %v838_v18, 0.0 }
 0xaaa   :  { %843 = vadd.xlane.f32.xlu1 %v842_v19 }
 0xb35   :  { %v841_v21 = vpop.xlane.xlu0 %840 }
 0xb36   :  { %v845_v22 = vmul.f32 0.03125, %v841_v21 }
 0xb37   :  { %v844_v23 = vpop.xlane.xlu1 %843 }
 0xb38   :  { %v847_v24 = vsub.f32 %v837_v16, %v845_v22  ;;  %v846_v25 = vmul.f32 0.03125, %v844_v23 }
 0xb3a   :  { %v848_v26 = vsub.f32 %v838_v18, %v846_v25  ;;  %v849_v28 = vmul.f32 %v847_v24, %v847_v24 }
 0xb3c   :  { %v851_v29 = vsel %vm41_vm1, %v849_v28, 0.0  ;;  %v850_v30 = vmul.f32 %v848_v26, %v848_v26 }
 0xb3d   :  { %852 = vadd.xlane.f32.xlu0 %v851_v29 }
 0xb3e   :  { %v854_v31 = vsel %vm41_vm1, %v850_v30, 0.0 }
 0xb3f   :  { %855 = vadd.xlane.f32.xlu1 %v854_v31 }
 0xbca   :  { %v853_v32 = vpop.xlane.xlu0 %852 }
 0xbcb   :  { %v857_v33 = vmul.f32 0.03125, %v853_v32 }
 0xbcc   :  { %v856_v34 = vpop.xlane.xlu1 %855 }
 0xbcd   :  { %v859_v35 = vadd.f32 1e-05, %v857_v33  ;;  %v858_v36 = vmul.f32 0.03125, %v856_v34 }
 0xbcf   :  { %2110 = vrsqrt.f32 %v859_v35  ;;  %v860_v37 = vadd.f32 1e-05, %v858_v36 }
 0xbd1   :  { %2112 = vrsqrt.f32 %v860_v37 }
 0xbd9   :  { %v2111_v41 = vpop.eup %2110 }
 0xbda   :  { %v863_v43 = vmul.f32 %v2111_v41, %v847_v24 }
 0xbdb   :  { %v2113_v45 = vpop.eup %2112 }
 0xbdc   :  { %v869_v46 = vmul.f32 %v868_v39, %v863_v43  ;;  %v864_v11 = vmul.f32 %v2113_v45, %v848_v26 }
 0xbde   :  { %v870_v47 = vmul.f32 %v868_v39, %v864_v11  ;;  %v2481_v48 = vadd.f32 %v874_v44, %v869_v46 }
 0xbe0   :  { %v2483_v49 = vadd.f32 %v874_v44, %v870_v47  ;;  %1768 = vst.msk [vmem:[%s2701_s10 + $0x10] sm:$0xff] %vm41_vm1, %v2481_v48 }
 0xbe2   :  { %1769 = vst.msk [vmem:[%s2701_s10 + $0x18] sm:$0xff] %vm41_vm1, %v2483_v49  ;;  %v882_v9 = vpack.c.bf16 %v2483_v49, %v2481_v48 }
 0xbe4   :  { %1970 = vmatmul.mubr.msk.bf16.vlgmr.msra.gmra.mrb[20].mxu0 %vm41_vm1, %v882_v9 }
 0xbe5   :  { %1975 = vmatprep.mubr.msk.bf16.mxu0 %vm2163_vm0, %v2162_v1 }
 0xcb7   :  { %v945_v51 = vpop.f32.mrb[20].mxu0 }
 0xcb8   :  { %v946_v52 = vadd.f32 %v1776_v50, %v945_v51  ;;  %v1971_v53 = vpop.f32.mrb[21].mxu0 }
 0xcb9   :  { %v948_v54 = vpop.f32.mrb[22].mxu0 }
 0xcba   :  { %v2503_v55 = vpack.c.bf16 %v946_v52, %v946_v52  ;;  %v949_v56 = vadd.f32 %v1776_v50, %v948_v54  ;;  %v1972_v57 = vpop.f32.mrb[23].mxu0 }
 0xcbc   :  { %v2505_v58 = vpack.c.bf16 %v949_v56, %v949_v56  ;;  %955 = vrot.lane.b32.xlu0 %v2503_v55, %s2164_s30 }
 0xcbe   :  { %1004 = vrot.lane.b32.xlu1 %v2505_v58, %s2164_s30 }
 0xd2e   :  { %v956_v59 = vpop.permute.xlu0 %955 }
 0xd2f   :  { %v961_v60 = vsel %vm118_vm2, %v956_v59, 0 }
 0xd30   :  { %1974 = vmatpush3.bf16.xpose.msra.mxu0 %v961_v60  ;;  %v1005_v61 = vpop.permute.xlu1 %1004 }
 0xd31   :  { %v1010_v62 = vsel %vm118_vm2, %v1005_v61, 0  ;;  %1985 = vmatprep.subr.bf16.mxu0 %v2162_v1 }
 0xd32   :  { %1980 = vmatpush3.bf16.xpose.msra.mxu1 %v1010_v62 }
 0xd33   :  { %1991 = vmatprep.subr.bf16.mxu1 %v2162_v1 }
 0xd37   :  { %1976 = vmatmul.mubr.msk.bf16.vlgmr.msra.gmra.mrb[24].mxu0 %vm118_vm2, %v2503_v55 }
 0xd38   :  { %1987 = vmatprep.mubr.msk.bf16.mxu0 %vm2163_vm0, %v2162_v1 }
 0xd39   :  { %1982 = vmatmul.mubr.msk.bf16.vlgmr.msra.gmra.mrb[28].mxu1 %vm118_vm2, %v2505_v58 }
 0xd3a   :  { %1993 = vmatprep.mubr.msk.bf16.mxu1 %vm2163_vm0, %v2162_v1 }
 0xe0a   :  { %v997_v0 = vpop.f32.mrb[24].mxu0 }
 0xe0b   :  { %v1052_v5 = vmul.f32 0.25, %v997_v0  ;;  %v1977_v63 = vpop.f32.mrb[25].mxu0 }
 0xe0c   :  { %v1000_v6 = vpop.f32.mrb[26].mxu0  ;;  %v1046_v10 = vpop.f32.mrb[28].mxu1 }
 0xe0d   :  { %v1053_v12 = vmul.f32 0.25, %v1046_v10  ;;  %v1978_v13 = vpop.f32.mrb[27].mxu0  ;;  %v1983_v15 = vpop.f32.mrb[29].mxu1  ;;  %v1054_v16 = vadd.f32 %v1052_v5, %v2298_v20 }
 0xe0e   :  { %v1049_v17 = vpop.f32.mrb[30].mxu1 }
 0xe0f   :  { %v1984_v18 = vpop.f32.mrb[31].mxu1  ;;  %v1056_v19 = vsel %vm218_vm3, %v1054_v16, -inf  ;;  %v1055_v21 = vadd.f32 %v1053_v12, %v2304_v27 }
 0xe10   :  { %1057 = vmax.xlane.f32.xlu1 %v1056_v19 }
 0xe11   :  { %v1059_v22 = vsel %vm218_vm3, %v1055_v21, -inf }
 0xe12   :  { %1060 = vmax.xlane.f32.xlu0 %v1059_v22 }
 0xe21   :  { %1131 = vrot.lane.b32.xlu1 %v2505_v58, %s2165_s16 }
 0xe28   :  { %1083 = vrot.lane.b32.xlu0 %v2503_v55, %s2165_s16 }
 0xe9d   :  { %v1058_v23 = vpop.xlane.xlu1 %1057 }
 0xe9e   :  { %v1062_v24 = vsub.f32 %v1054_v16, %v1058_v23 }
 0xe9f   :  { %v1061_v25 = vpop.xlane.xlu0 %1060 }
 0xea0   :  { %v1064_v26 = vmul.f32 1.442695, %v1062_v24  ;;  %v1063_v28 = vsub.f32 %v1055_v21, %v1061_v25 }
 0xea1   :  { %v1132_v29 = vpop.permute.xlu1 %1131 }
 0xea2   :  { %2114 = vpow2.f32 %v1064_v26  ;;  %v1066_v30 = vmul.f32 1.442695, %v1063_v28  ;;  %v1137_v31 = vsel %vm250_vm4, %v1132_v29, 0 }
 0xea3   :  { %1992 = vmatpush3.bf16.msra.mxu1 %v1137_v31  ;;  %v1084_v3 = vpop.permute.xlu0 %1083 }
 0xea4   :  { %2116 = vpow2.f32 %v1066_v30  ;;  %v1089_v4 = vsel %vm250_vm4, %v1084_v3, 0  ;;  %2003 = vmatprep.subr.bf16.mxu1 %v2162_v1 }
 0xea5   :  { %1986 = vmatpush3.bf16.msra.mxu0 %v1089_v4 }
 0xea6   :  { %1997 = vmatprep.subr.bf16.mxu0 %v2162_v1 }
 0xeac   :  { %v2115_v32 = vpop.eup %2114 }
 0xead   :  { %v1068_v33 = vsel %vm218_vm3, %v2115_v32, 0.0 }
 0xeae   :  { %v2117_v34 = vpop.eup %2116  ;;  %1069 = vadd.xlane.f32.xlu0 %v1068_v33 }
 0xeaf   :  { %v1071_v35 = vsel %vm218_vm3, %v2117_v34, 0.0 }
 0xeb0   :  { %1072 = vadd.xlane.f32.xlu1 %v1071_v35 }
 0xec1   :  { %1181 = vrot.lane.b32.xlu1 %v2503_v55, %s2166_s1 }
 0xec4   :  { %1231 = vrot.lane.b32.xlu0 %v2505_v58, %s2166_s1 }
 0xec5   :  { %1179 = vrot.lane.b32.xlu1 %v2503_v55, %s2167_s17 }
 0xec8   :  { %1229 = vrot.lane.b32.xlu0 %v2505_v58, %s2167_s17 }
 0xf3b   :  { %v1070_v36 = vpop.xlane.xlu0 %1069 }
 0xf3c   :  { %2118 = vrcp.f32 %v1070_v36 }
 0xf3d   :  { %v1073_v37 = vpop.xlane.xlu1 %1072 }
 0xf3e   :  { %2120 = vrcp.f32 %v1073_v37 }
 0xf3f   :  { %v1232_v11 = vpop.permute.xlu0 %1231 }
 0xf40   :  { %v1237_v50 = vsel %vm118_vm2, %v1232_v11, 0 }
 0xf41   :  { %v1182_v44 = vpop.permute.xlu1 %1181 }
 0xf42   :  { %v1187_v47 = vsel %vm118_vm2, %v1182_v44, 0  ;;  %v2083_v44 = vld [vmem:[%s2695_s4 + $0x18] sm:$0xff]  }
 0xf43   :  { %v1230_v52 = vpop.permute.xlu0 %1229 }
 0xf45   :  { %v1180_v51 = vpop.permute.xlu1 %1179 }
 0xf46   :  { %v2119_v39 = vpop.eup %2118 }
 0xf47   :  { %v1076_v41 = vmul.f32 %v2119_v39, %v2115_v32 }
 0xf48   :  { %v2121_v43 = vpop.eup %2120 }
 0xf49   :  { %1782 = vst.msk [vmem:[%s2702_s11 + $0x20] sm:$0xff] %vm218_vm3, %v1076_v41  ;;  %v1077_v45 = vmul.f32 %v2121_v43, %v2117_v34  ;;  %v1081_v46 = vpack.c.bf16 %v1076_v41, %v1076_v41  ;;  %v2082_v43 = vld [vmem:[%s2695_s4 + $0x10] sm:$0xff]  }
 0xf4b   :  { %1783 = vst.msk [vmem:[%s2702_s11 + $0x28] sm:$0xff] %vm218_vm3, %v1077_v45  ;;  %1988 = vmatmul.mubr.msk.bf16.vlgmr.msra.gmra.mrb[28].mxu0 %vm218_vm3, %v1081_v46  ;;  %v1082_v9 = vpack.c.bf16 %v1077_v45, %v1077_v45 }
 0xf4c   :  { %1998 = vmatpush3.bf16.xpose.msra.mxu0 %v1187_v47  ;;  %1999 = vmatprep.mubr.msk.bf16.mxu0 %vm2163_vm0, %v2162_v1 }
 0xf4d   :  { %1994 = vmatmul.mubr.msk.bf16.vlgmr.msra.gmra.mrb[32].mxu1 %vm218_vm3, %v1082_v9  ;;  %2009 = vmatprep.subr.bf16.mxu0 %v2162_v1 }
 0xf4e   :  { %2004 = vmatpush3.bf16.xpose.msra.mxu1 %v1237_v50  ;;  %2005 = vmatprep.mubr.msk.bf16.mxu1 %vm2163_vm0, %v2162_v1 }
 0xf4f   :  { %2015 = vmatprep.subr.bf16.mxu1 %v2162_v1 }
 0xf53   :  { %2000 = vmatmul.mubr.msk.bf16.vlgmr.msra.gmra.mrb[32].mxu0 %vm118_vm2, %v1180_v51 }
 0xf54   :  { %2011 = vmatprep.mubr.msk.bf16.mxu0 %vm2163_vm0, %v2162_v1 }
 0xf55   :  { %2006 = vmatmul.mubr.msk.bf16.vlgmr.msra.gmra.mrb[36].mxu1 %vm118_vm2, %v1230_v52 }
 0xf56   :  { %2017 = vmatprep.mubr.msk.bf16.mxu1 %vm2163_vm0, %v2162_v1 }
0x101e   :  { %v2569_v53 = vpop.f32.mrb[28].mxu0 }
0x101f   :  { %v1989_v54 = vpop.f32.mrb[29].mxu0 }
0x1020   :  { %v1128_v56 = vpop.f32.mrb[30].mxu0  ;;  %v2571_v57 = vpop.f32.mrb[32].mxu1 }
0x1021   :  { %v1990_v59 = vpop.f32.mrb[31].mxu0  ;;  %v1995_v60 = vpop.f32.mrb[33].mxu1 }
0x1022   :  { %v1176_v61 = vpop.f32.mrb[34].mxu1 }
0x1023   :  { %v1996_v62 = vpop.f32.mrb[35].mxu1 }
0x1026   :  { %v1223_v0 = vpop.f32.mrb[32].mxu0 }
0x1027   :  { %v1279_v5 = vmul.f32 0.25, %v1223_v0  ;;  %v2001_v63 = vpop.f32.mrb[33].mxu0 }
0x1028   :  { %v1226_v6 = vpop.f32.mrb[34].mxu0  ;;  %v1273_v10 = vpop.f32.mrb[36].mxu1 }
0x1029   :  { %v1280_v12 = vmul.f32 0.25, %v1273_v10  ;;  %v2002_v13 = vpop.f32.mrb[35].mxu0  ;;  %v2007_v15 = vpop.f32.mrb[37].mxu1  ;;  %v1281_v16 = vadd.f32 %v1279_v5, %v2298_v20  ;;  %v2620_v5 = vld [vmem:[%s2699_s8 + $0x8] sm:$0x3f] }
0x102a   :  { %v1276_v17 = vpop.f32.mrb[38].mxu1  ;;  %v1425_v63 = vrot.slane %v2620_v5, %v586_v8 }
0x102b   :  { %v2008_v18 = vpop.f32.mrb[39].mxu1  ;;  %v1283_v19 = vsel %vm218_vm3, %v1281_v16, -inf  ;;  %v1282_v21 = vadd.f32 %v1280_v12, %v2304_v27 }
0x102c   :  { %1284 = vmax.xlane.f32.xlu1 %v1283_v19 }
0x102d   :  { %v1286_v22 = vsel %vm218_vm3, %v1282_v21, -inf }
0x102e   :  { %1287 = vmax.xlane.f32.xlu0 %v1286_v22 }
0x10b9   :  { %v1285_v23 = vpop.xlane.xlu1 %1284 }
0x10ba   :  { %v1289_v24 = vsub.f32 %v1281_v16, %v1285_v23 }
0x10bb   :  { %v1288_v25 = vpop.xlane.xlu0 %1287 }
0x10bc   :  { %v1291_v26 = vmul.f32 1.442695, %v1289_v24  ;;  %v1290_v28 = vsub.f32 %v1282_v21, %v1288_v25 }
0x10be   :  { %2122 = vpow2.f32 %v1291_v26  ;;  %v1293_v29 = vmul.f32 1.442695, %v1290_v28 }
0x10c0   :  { %2124 = vpow2.f32 %v1293_v29  ;;  %v2085_v29 = vld [vmem:[%s2696_s5 + $0x18] sm:$0xff]  }
0x10c8   :  { %v2123_v30 = vpop.eup %2122 }
0x10c9   :  { %v1295_v20 = vsel %vm218_vm3, %v2123_v30, 0.0 }
0x10ca   :  { %v2125_v31 = vpop.eup %2124  ;;  %1296 = vadd.xlane.f32.xlu0 %v1295_v20  ;;  %v2087_v20 = vld [vmem:[%s2698_s7 + $0x28] sm:$0xff]  }
0x10cb   :  { %v1298_v3 = vsel %vm218_vm3, %v2125_v31, 0.0 }
0x10cc   :  { %1299 = vadd.xlane.f32.xlu1 %v1298_v3 }
0x10dd   :  { %1358 = vrot.lane.b32.xlu1 %v2505_v58, %s2168_s22 }
0x10e0   :  { %1310 = vrot.lane.b32.xlu0 %v2503_v55, %s2168_s22 }
0x1157   :  { %v1297_v27 = vpop.xlane.xlu0 %1296 }
0x1158   :  { %2126 = vrcp.f32 %v1297_v27 }
0x1159   :  { %v1300_v4 = vpop.xlane.xlu1 %1299 }
0x115a   :  { %2128 = vrcp.f32 %v1300_v4 }
0x115b   :  { %v1311_v32 = vpop.permute.xlu0 %1310 }
0x115c   :  { %v1316_v33 = vsel %vm250_vm4, %v1311_v32, 0 }
0x115d   :  { %v1359_v34 = vpop.permute.xlu1 %1358  ;;  %2010 = vmatpush3.bf16.msra.mxu0 %v1316_v33 }
0x115e   :  { %v1364_v35 = vsel %vm250_vm4, %v1359_v34, 0  ;;  %2021 = vmatprep.subr.bf16.mxu0 %v2162_v1 }
0x115f   :  { %2016 = vmatpush3.bf16.msra.mxu1 %v1364_v35  ;;  %v1513_v35 = vrot.slane %v2620_v5, %v675_v40  ;;  %v2089_v40 = vld [vmem:[%s2698_s7 + $0x38] sm:$0xff]  }
0x1160   :  { %2029 = vmatprep.subr.bf16.mxu1 %v2162_v1 }
0x1162   :  { %v2127_v58 = vpop.eup %2126 }
0x1163   :  { %v1303_v36 = vmul.f32 %v2127_v58, %v2123_v30  ;;  %v2086_v30 = vld [vmem:[%s2698_s7 + $0x20] sm:$0xff]  }
0x1164   :  { %v2129_v37 = vpop.eup %2128 }
0x1165   :  { %1788 = vst.msk [vmem:[%s2702_s11 + $0x30] sm:$0xff] %vm218_vm3, %v1303_v36  ;;  %v1304_v55 = vmul.f32 %v2129_v37, %v2125_v31  ;;  %v1308_v39 = vpack.c.bf16 %v1303_v36, %v1303_v36 }
0x1167   :  { %1789 = vst.msk [vmem:[%s2702_s11 + $0x38] sm:$0xff] %vm218_vm3, %v1304_v55  ;;  %2012 = vmatmul.mubr.msk.bf16.vlgmr.msra.gmra.mrb[36].mxu0 %vm218_vm3, %v1308_v39  ;;  %v1309_v41 = vpack.c.bf16 %v1304_v55, %v1304_v55  ;;  %v1519_v39 = vrot.slane %v2620_v5, %v681_v42  ;;  %v1804_v42 = vld [vmem:[%s2697_s6 + $0x1] ss:$0 sm:$0xff]  ;;  %s2170_s6 = smov [#allocation2]  }
0x1168   :  { %2025 = vmatprep.mubr.msk.bf16.mxu0 %vm2163_vm0, %v2162_v1  ;;  %2022 = vmatpush3.bf16.msra.mxu0 %v2082_v43 }
0x1169   :  { %2018 = vmatmul.mubr.msk.bf16.vlgmr.msra.gmra.mrb[40].mxu1 %vm218_vm3, %v1309_v41  ;;  %2023 = vmatprep.subr.bf16.mxu0 %v2162_v1 }
0x116a   :  { %2033 = vmatprep.mubr.msk.bf16.mxu1 %vm2163_vm0, %v2162_v1 }
0x116c   :  { %2024 = vmatpush3.bf16.msra.mxu0 %v2083_v44 }
0x116d   :  { %2037 = vmatprep.subr.bf16.mxu0 %v2162_v1 }
0x123a   :  { %v1352_v45 = vpop.f32.mrb[36].mxu0 }
0x123b   :  { %v2013_v46 = vpop.f32.mrb[37].mxu0 }
0x123c   :  { %v1355_v11 = vpop.f32.mrb[38].mxu0  ;;  %v1400_v47 = vpop.f32.mrb[40].mxu1  ;;  %v2088_v46 = vld [vmem:[%s2698_s7 + $0x30] sm:$0xff]   ;;  %s1723_s7 = sshll.u32 %s2170_s6, 4  ;;  %s1724_s7 = int_to_ptr.vmem [resolvable:$true] %s1723_s7 }
0x123d   :  { %v2065_v9 = vpack.i.bf16 %v1400_v47, %v1352_v45  ;;  %v2014_v50 = vpop.f32.mrb[39].mxu0  ;;  %v2019_v51 = vpop.f32.mrb[41].mxu1  ;;  %s2138_s3 = scalar_lea.vmem %s1724_s7, 256  ;;  %p2143_p1 = scmp.lt.s32.totalorder %s1724_s7, %s1724_s7 }
0x123e   :  { %v1403_v52 = vpop.f32.mrb[42].mxu1  ;;  %p2139_p0 = scmp.ne.s32.totalorder %s1724_s7, %s2138_s3  ;;  %p2144_p2 = scmp.lt.s32.totalorder %s2138_s3, %s2138_s3 }
0x123f   :  { %2066 = vrot.lane.b32.xlu1 %v2065_v9, %s2169_s12  ;;  %v2020_v54 = vpop.f32.mrb[43].mxu1 }
0x1240   :  { %p2145_p3 = por %p2144_p2, %p2143_p1 }
0x1242   :  { %p2146_p4 = pnand %p2145_p3, %p2139_p0 }
0x12b1   :  { %v2067_v56 = vpop.permute.xlu1 %2066 }
0x12b2   :  { %v2069_v59 = vunpack.i.h.bf16 %v2067_v56  ;;  %v2068_v60 = vunpack.i.l.bf16 %v2067_v56 }
0x12b4   :  { %v1415_v61 = vsel %vm118_vm2, %v2571_v57, %v2069_v59  ;;  %v1414_v62 = vsel %vm118_vm2, %v2569_v53, %v2068_v60 }
0x12b5   :  { %v1416_v0 = vpack.c.bf16 %v1415_v61, %v1414_v62 }
0x12b7   :  { %2026 = vmatmul.mubr.msk.bf16.vlgmr.msra.gmra.mrb[40].mxu0 %vm41_vm1, %v1416_v0 }
0x12b8   :  { %2045 = vmatprep.mubr.msk.bf16.mxu0 %vm2163_vm0, %v2162_v1  ;;  %2038 = vmatpush3.bf16.msra.mxu0 %v2086_v30 }
0x12b9   :  { %2039 = vmatprep.subr.bf16.mxu0 %v2162_v1 }
0x12bc   :  { %2040 = vmatpush3.bf16.msra.mxu0 %v2087_v20  ;;  %v1713_v20 = vrot.slane %v2620_v5, %v873_v14 }
0x12bd   :  { %2041 = vmatprep.subr.bf16.mxu0 %v2162_v1 }
0x12c0   :  { %2042 = vmatpush3.bf16.msra.mxu0 %v2088_v46 }
0x12c1   :  { %2043 = vmatprep.subr.bf16.mxu0 %v2162_v1 }
0x12c4   :  { %2044 = vmatpush3.bf16.msra.mxu0 %v2089_v40 }
0x138a   :  { %v1475_v6 = vpop.f32.mrb[40].mxu0 }
0x138b   :  { %v1476_v57 = vadd.f32 %v1475_v6, %v1425_v63  ;;  %v2027_v10 = vpop.f32.mrb[41].mxu0 }
0x138c   :  { %v1478_v12 = vpop.f32.mrb[42].mxu0 }
0x138d   :  { %v1479_v53 = vadd.f32 %v1478_v12, %v1425_v63  ;;  %v2028_v13 = vpop.f32.mrb[43].mxu0  ;;  %v1482_v15 = vadd.f32 %v1476_v57, %v2481_v48 }
0x138f   :  { %v1484_v16 = vsel %vm41_vm1, %v1482_v15, 0.0  ;;  %v1483_v17 = vadd.f32 %v1479_v53, %v2483_v49  ;;  %v2084_v49 = vld [vmem:[%s2696_s5 + $0x10] sm:$0xff]  }
0x1390   :  { %1485 = vadd.xlane.f32.xlu0 %v1484_v16  ;;  %2030 = vmatpush3.bf16.msra.mxu1 %v2084_v49  ;;  %v1707_v49 = vrot.slane %v2620_v5, %v867_v38 }
0x1391   :  { %v1487_v18 = vsel %vm41_vm1, %v1483_v17, 0.0  ;;  %2031 = vmatprep.subr.bf16.mxu1 %v2162_v1  ;;  %v1607_v1 = vrot.slane %v2620_v5, %v766_v2 }
0x1392   :  { %1488 = vadd.xlane.f32.xlu1 %v1487_v18 }
0x1394   :  { %2032 = vmatpush3.bf16.msra.mxu1 %v2085_v29 }
0x141d   :  { %v1486_v19 = vpop.xlane.xlu0 %1485 }
0x141e   :  { %v1490_v21 = vmul.f32 0.03125, %v1486_v19 }
0x141f   :  { %v1489_v22 = vpop.xlane.xlu1 %1488 }
0x1420   :  { %v1492_v8 = vsub.f32 %v1482_v15, %v1490_v21  ;;  %v1491_v23 = vmul.f32 0.03125, %v1489_v22 }
0x1422   :  { %v1493_v24 = vsub.f32 %v1483_v17, %v1491_v23  ;;  %v1494_v25 = vmul.f32 %v1492_v8, %v1492_v8 }
0x1424   :  { %v1496_v26 = vsel %vm41_vm1, %v1494_v25, 0.0  ;;  %v1495_v28 = vmul.f32 %v1493_v24, %v1493_v24 }
0x1425   :  { %1497 = vadd.xlane.f32.xlu0 %v1496_v26 }
0x1426   :  { %v1499_v48 = vsel %vm41_vm1, %v1495_v28, 0.0 }
0x1429   :  { %1500 = vadd.xlane.f32.xlu0 %v1499_v48 }
0x14b2   :  { %v1498_v31 = vpop.xlane.xlu0 %1497 }
0x14b3   :  { %v1502_v3 = vmul.f32 0.03125, %v1498_v31 }
0x14b5   :  { %v1504_v27 = vadd.f32 1e-05, %v1502_v3 }
0x14b6   :  { %v1501_v4 = vpop.xlane.xlu0 %1500 }
0x14b7   :  { %2130 = vrsqrt.f32 %v1504_v27  ;;  %v1503_v32 = vmul.f32 0.03125, %v1501_v4 }
0x14b9   :  { %v1505_v33 = vadd.f32 1e-05, %v1503_v32 }
0x14bb   :  { %2132 = vrsqrt.f32 %v1505_v33 }
0x14c1   :  { %v2131_v34 = vpop.eup %2130 }
0x14c2   :  { %v1508_v58 = vmul.f32 %v2131_v34, %v1492_v8 }
0x14c4   :  { %v1514_v37 = vmul.f32 %v1513_v35, %v1508_v58 }
0x14c5   :  { %v2133_v36 = vpop.eup %2132 }
0x14c6   :  { %v1509_v55 = vmul.f32 %v2133_v36, %v1493_v24  ;;  %v1520_v43 = vadd.f32 %v1519_v39, %v1514_v37 }
0x14c8   :  { %v1515_v41 = vmul.f32 %v1513_v35, %v1509_v55 }
0x14ca   :  { %v1521_v44 = vadd.f32 %v1519_v39, %v1515_v41 }
0x14cc   :  { %v1522_v45 = vpack.c.bf16 %v1521_v44, %v1520_v43 }
0x14ce   :  { %2034 = vmatmul.mubr.msk.bf16.vlgmr.msra.gmra.mrb[44].mxu1 %vm41_vm1, %v1522_v45 }
0x15a1   :  { %v1585_v11 = vpop.f32.mrb[44].mxu1 }
0x15a2   :  { %v1586_v47 = vadd.f32 %v1804_v42, %v1585_v11  ;;  %v2035_v9 = vpop.f32.mrb[45].mxu1 }
0x15a3   :  { %v1588_v50 = vpop.f32.mrb[46].mxu1 }
0x15a4   :  { %v1589_v51 = vadd.f32 %v1804_v42, %v1588_v50  ;;  %v2036_v52 = vpop.f32.mrb[47].mxu1  ;;  %v1592_v54 = vmax.f32 %v1586_v47, 0.0 }
0x15a6   :  { %v1593_v56 = vmax.f32 %v1589_v51, 0.0 }
0x15a8   :  { %v1594_v59 = vpack.c.bf16 %v1593_v56, %v1592_v54 }
0x15aa   :  { %2046 = vmatmul.mubr.msk.bf16.vlgmr.msra.gmra.mrb[44].mxu0 %vm792_vm5, %v1594_v59 }
0x167d   :  { %v1669_v60 = vpop.f32.mrb[44].mxu0 }
0x167e   :  { %v1670_v61 = vadd.f32 %v1669_v60, %v1607_v1  ;;  %v2047_v62 = vpop.f32.mrb[45].mxu0 }
0x167f   :  { %v1672_v0 = vpop.f32.mrb[46].mxu0 }
0x1680   :  { %v1673_v63 = vadd.f32 %v1672_v0, %v1607_v1  ;;  %v2048_v6 = vpop.f32.mrb[47].mxu0  ;;  %v1676_v57 = vadd.f32 %v1670_v61, %v1520_v43 }
0x1682   :  { %v1678_v10 = vsel %vm41_vm1, %v1676_v57, 0.0  ;;  %v1677_v12 = vadd.f32 %v1673_v63, %v1521_v44 }
0x1683   :  { %1679 = vadd.xlane.f32.xlu1 %v1678_v10 }
0x1684   :  { %v1681_v53 = vsel %vm41_vm1, %v1677_v12, 0.0 }
0x1685   :  { %1682 = vadd.xlane.f32.xlu0 %v1681_v53 }
0x1710   :  { %v1680_v13 = vpop.xlane.xlu1 %1679 }
0x1711   :  { %v1684_v15 = vmul.f32 0.03125, %v1680_v13 }
0x1712   :  { %v1683_v16 = vpop.xlane.xlu0 %1682 }
0x1713   :  { %v1686_v17 = vsub.f32 %v1676_v57, %v1684_v15  ;;  %v1685_v18 = vmul.f32 0.03125, %v1683_v16 }
0x1715   :  { %v1687_v2 = vsub.f32 %v1677_v12, %v1685_v18  ;;  %v1688_v19 = vmul.f32 %v1686_v17, %v1686_v17 }
0x1717   :  { %v1690_v21 = vsel %vm41_vm1, %v1688_v19, 0.0  ;;  %v1689_v22 = vmul.f32 %v1687_v2, %v1687_v2 }
0x1718   :  { %1691 = vadd.xlane.f32.xlu1 %v1690_v21 }
0x1719   :  { %v1693_v8 = vsel %vm41_vm1, %v1689_v22, 0.0 }
0x171a   :  { %1694 = vadd.xlane.f32.xlu0 %v1693_v8 }
0x17a5   :  { %v1692_v23 = vpop.xlane.xlu1 %1691 }
0x17a6   :  { %v1696_v24 = vmul.f32 0.03125, %v1692_v23 }
0x17a7   :  { %v1695_v25 = vpop.xlane.xlu0 %1694 }
0x17a8   :  { %v1698_v26 = vadd.f32 1e-05, %v1696_v24  ;;  %v1697_v28 = vmul.f32 0.03125, %v1695_v25 }
0x17aa   :  { %2134 = vrsqrt.f32 %v1698_v26  ;;  %v1699_v48 = vadd.f32 1e-05, %v1697_v28 }
0x17ac   :  { %2136 = vrsqrt.f32 %v1699_v48 }
0x17b4   :  { %v2135_v29 = vpop.eup %2134 }
0x17b5   :  { %v1702_v30 = vmul.f32 %v2135_v29, %v1686_v17 }
0x17b6   :  { %v2137_v31 = vpop.eup %2136 }
0x17b7   :  { %v1703_v3 = vmul.f32 %v2137_v31, %v1687_v2  ;;  %v1708_v27 = vmul.f32 %v1707_v49, %v1702_v30 }
0x17b9   :  { %v1709_v4 = vmul.f32 %v1707_v49, %v1703_v3  ;;  %v1714_v32 = vadd.f32 %v1713_v20, %v1708_v27 }
0x17bb   :  { %v1715_v33 = vadd.f32 %v1713_v20, %v1709_v4  ;;  %1716 = vst.msk [vmem:[#allocation2] sm:$0xff] %vm41_vm1, %v1714_v32 }
0x17bd   :  { %1717 = vst.msk [vmem:[#allocation2 + $0x8] sm:$0xff] %vm41_vm1, %v1715_v33 }
0x17be   :  { %2149 = shalt.err (!%p2146_p4)
}
0x17bf   :  { %s2150_s16 = scalar_lea.hbm %s2700_s9, 256 }
0x17c0   :  { %p2151_p5 = scmp.ne.s32.totalorder %s2700_s9, %s2150_s16  ;;  %p2154_p6 = scmp.lt.u32.totalorder %s2150_s16, %s2700_s9 }
0x17c2   :  { %p2156_p7 = pnand %p2154_p6, %p2151_p5 }
0x17c4   :  { %2159 = shalt.err (!%p2156_p7)
}
0x17c5   :  { %s2171_s27 = smov 128   ;;  %s2172_s28 = smov 8  }
0x17c6   :  { %1729 = dma.vmem_to_hbm [thread:$0]  %s1724_s7, 256, %s2700_s9, [#allocation3], %s2171_s27, %s2171_s27, %s2172_s28  }
0x17c7   :  { %2160 = dma.done.wait [#allocation3], 256  }
0x17c8   :  { %2161 = vsyncadd [#allocation3], 4294967040 }
0x17c9   :  { %1741 = vsyncpa [#allocation3], 1 }

</bundles_post_ra>
